<compile_context>
chip_gen: v7x
topology: tpu7x:2x2x1
jax: 0.10.0
libtpu: 0.0.40
codegen_flags: <defaults>
</compile_context>

<pallas_src>
import functools

import jax
import jax.numpy as jnp
from jax.experimental import pallas as pl
from jax.experimental.pallas import tpu as pltpu


# ----------------------- hardware / sizing helpers -----------------------
_VMEM_CAP_CACHE = None


def _vmem_capacity_bytes():
    """Per-core VMEM capacity; conservative 64 MiB fallback (v7x) if query fails."""
    global _VMEM_CAP_CACHE
    if _VMEM_CAP_CACHE is None:
        cap = None
        try:
            cap = int(getattr(pltpu.get_tpu_info(), "vmem_capacity_bytes", 0)) or None
        except Exception:
            cap = None
        _VMEM_CAP_CACHE = cap if cap else 64 * 1024 * 1024
    return _VMEM_CAP_CACHE


def _vmem_limit_bytes():
    cap = _vmem_capacity_bytes()
    return max(32 * 1024 * 1024, min(int(cap * 0.85), cap - 4 * 1024 * 1024))


def _vmem_tile_budget_bytes():
    # headroom below the compiler limit for internal scratch / double counting
    return int(_vmem_capacity_bytes() * 0.6)


def _round_up(x, m):
    return ((x + m - 1) // m) * m


def _pick_tile(n_pad, candidates):
    """Largest candidate that divides n_pad (n_pad is a multiple of 128, so 128 always works)."""
    for c in candidates:
        if c <= n_pad and n_pad % c == 0:
            return c
    return n_pad


def _pick_tm(n_pad):
    """Row tile: prefer >=2 row tiles so the 'parallel' axis can shard across v7x's 2 TCs."""
    for tm in (512, 256, 128):
        if n_pad % tm == 0 and n_pad // tm >= 2:
            return tm
    for tm in (512, 256, 128):
        if n_pad % tm == 0:
            return tm
    return 128


def _stage2_vmem_bytes(tm, tk, n_pad, d_out, csz, osz, xw_resident):
    a_bytes = 2 * tm * tk * csz                       # A tiles, double-buffered
    if xw_resident:
        xw_bytes = 2 * n_pad * d_out * csz            # conservative (count 2 bufs)
    else:
        xw_bytes = 2 * tk * d_out * csz
    out_bytes = 2 * tm * d_out * osz
    acc_bytes = tm * d_out * 4
    return a_bytes + xw_bytes + out_bytes + acc_bytes


def _pick_tk(n_pad, tm, d_out, csz, osz, budget, xw_resident):
    for tk in (2048, 1024, 512, 256, 128):
        if n_pad % tk:
            continue
        if _stage2_vmem_bytes(tm, tk, n_pad, d_out, csz, osz, xw_resident) <= budget:
            return tk
    return 128


# ----------------------- kernels -----------------------
def _xw_kernel(x_ref, w_ref, o_ref):
    """XW = X @ W for one row tile of X; W is VMEM-resident (constant index_map)."""
    o_ref[...] = jnp.dot(
        x_ref[...], w_ref[...], preferred_element_type=jnp.float32
    ).astype(o_ref.dtype)


def _aggregate_kernel(a_ref, xw_ref, o_ref, acc_ref, *, tk, activation, valid_cols,
                      xw_resident):
    """acc (+)= A[i,k] @ XW[k]; at k==last apply activation and store.

    a_ref: [tm, tk]; xw_ref: [n_pad, Dout_p] (resident) or [tk, Dout_p] (streamed);
    o_ref: [tm, Dout_p]; acc_ref: f32 [tm, Dout_p]
    """
    k = pl.program_id(1)

    if xw_resident:
        row0 = pl.multiple_of(k * tk, tk)
        xw_tile = xw_ref[pl.ds(row0, tk), :]
    else:
        xw_tile = xw_ref[...]

    prod = jnp.dot(a_ref[...], xw_tile, preferred_element_type=jnp.float32)

    @pl.when(k == 0)
    def _():
        acc_ref[...] = prod          # direct store: saves a zero-init store + add

    @pl.when(k > 0)
    def _():
        acc_ref[...] += prod

    @pl.when(k == pl.num_programs(1) - 1)
    def _():
        z = acc_ref[...]
        if activation == "relu":
            z = jnp.maximum(z, 0.0)
        elif activation == "softmax":
            if valid_cols is not None and valid_cols < z.shape[-1]:
                # mask zero-padded logit columns out of the softmax
                col = jax.lax.broadcasted_iota(jnp.int32, z.shape, dimension=1)
                z = jnp.where(col < valid_cols, z, jnp.float32(-1e30))
            m = jnp.max(z, axis=-1, keepdims=True)
            e = jnp.exp(z - m)
            s = jnp.sum(e, axis=-1, keepdims=True)
            z = e / s                 # exact reciprocal: epilogue runs once per row tile
        # activation == "none": passthrough
        o_ref[...] = z.astype(o_ref.dtype)


# ----------------------- one GCN layer -----------------------
def _gcn_layer(a_p, x_p, w_p, *, activation, valid_cols, out_dtype, compute_dtype):
    n_pad = a_p.shape[0]
    d_in = x_p.shape[1]
    d_out = w_p.shape[1]
    csz = jnp.dtype(compute_dtype).itemsize
    osz = jnp.dtype(out_dtype).itemsize
    vmem_limit = _vmem_limit_bytes()
    budget = _vmem_tile_budget_bytes()

    # ---- stage 1: XW = X @ W (rows of X tiled, W resident) ----
    tm_x = _pick_tile(n_pad, (512, 256, 128))
    while tm_x > 128 and (2 * tm_x * d_in * csz + 2 * d_in * d_out * csz
                          + 2 * tm_x * d_out * csz) > budget:
        tm_x //= 2
    xw = pl.pallas_call(
        _xw_kernel,
        out_shape=jax.ShapeDtypeStruct((n_pad, d_out), compute_dtype),
        grid=(n_pad // tm_x,),
        in_specs=[
            pl.BlockSpec((tm_x, d_in), lambda i: (i, 0)),
            pl.BlockSpec((d_in, d_out), lambda i: (0, 0)),
        ],
        out_specs=pl.BlockSpec((tm_x, d_out), lambda i: (i, 0)),
        compiler_params=pltpu.CompilerParams(
            dimension_semantics=("parallel",),
            vmem_limit_bytes=vmem_limit,
        ),
        cost_estimate=pl.CostEstimate(
            flops=int(2 * n_pad * d_in * d_out),
            transcendentals=0,
            bytes_accessed=int((n_pad * d_in + d_in * d_out + n_pad * d_out) * csz),
        ),
    )(x_p, w_p)

    # ---- stage 2: Z = act(A @ XW), (row, contraction)-tiled, f32 accumulator ----
    tm = _pick_tm(n_pad)
    # keep XW fully VMEM-resident (read once from HBM) whenever it fits the budget
    xw_resident = _stage2_vmem_bytes(tm, 128, n_pad, d_out, csz, osz, True) <= budget
    tk = _pick_tk(n_pad, tm, d_out, csz, osz, budget, xw_resident)
    n_i = n_pad // tm
    n_k = n_pad // tk

    if xw_resident:
        xw_spec = pl.BlockSpec((n_pad, d_out), lambda i, k: (0, 0))
        xw_hbm_bytes = n_pad * d_out * csz
    else:
        xw_spec = pl.BlockSpec((tk, d_out), lambda i, k: (k, 0))
        xw_hbm_bytes = n_i * n_pad * d_out * csz

    kernel = functools.partial(
        _aggregate_kernel,
        tk=tk,
        activation=activation,
        valid_cols=valid_cols,
        xw_resident=xw_resident,
    )
    return pl.pallas_call(
        kernel,
        out_shape=jax.ShapeDtypeStruct((n_pad, d_out), out_dtype),
        grid=(n_i, n_k),  # reduction axis (k) last
        in_specs=[
            pl.BlockSpec((tm, tk), lambda i, k: (i, k)),  # A_hat tile
            xw_spec,                                      # XW (resident or streamed)
        ],
        out_specs=pl.BlockSpec((tm, d_out), lambda i, k: (i, 0)),
        scratch_shapes=[pltpu.VMEM((tm, d_out), jnp.float32)],
        compiler_params=pltpu.CompilerParams(
            dimension_semantics=("parallel", "arbitrary"),
            vmem_limit_bytes=vmem_limit,
        ),
        cost_estimate=pl.CostEstimate(
            flops=int(2 * n_pad * n_pad * d_out),
            transcendentals=int(n_pad * d_out) if activation == "softmax" else 0,
            bytes_accessed=int(
                n_pad * n_pad * csz          # A_hat read once
                + xw_hbm_bytes               # XW (once if resident)
                + n_pad * d_out * osz        # output
            ),
        ),
    )(a_p, xw)


# ----------------------- padding (hoisted out of the hot path) -----------------------
def prepare_gcn_inputs(a_hat, x, w0, w_hidden, w1, *, compute_dtype=jnp.bfloat16):
    """Pad node count + feature dims to multiples of 128 and cast once; reuse per call."""
    n = a_hat.shape[0]
    c = x.shape[1]
    h = w0.shape[1]
    f = w1.shape[1]

    n_pad = _round_up(n, 128)
    c_pad = _round_up(c, 128)
    h_pad = _round_up(h, 128)
    f_pad = _round_up(f, 128)

    a_p = jnp.zeros((n_pad, n_pad), compute_dtype).at[:n, :n].set(a_hat.astype(compute_dtype))
    x_p = jnp.zeros((n_pad, c_pad), compute_dtype).at[:n, :c].set(x.astype(compute_dtype))
    w0_p = jnp.zeros((c_pad, h_pad), compute_dtype).at[:c, :h].set(w0.astype(compute_dtype))
    wh_p = tuple(
        jnp.zeros((h_pad, h_pad), compute_dtype).at[:h, :h].set(w.astype(compute_dtype))
        for w in w_hidden
    )
    w1_p = jnp.zeros((h_pad, f_pad), compute_dtype).at[:h, :f].set(w1.astype(compute_dtype))
    return (a_p, x_p, w0_p, wh_p, w1_p), (n, f)


# ----------------------- full forward (padded, jit this) -----------------------
def gcn_forward_padded(a_p, x_p, w0_p, wh_p, w1_p, *, num_classes,
                       compute_dtype=jnp.bfloat16):
    """Mirrors GCN.forward in eval mode (dropout == identity) on pre-padded inputs.

    Z = relu(A @ X @ W0); for Wh: Z = relu(A @ Z @ Wh); Z = A @ Z @ W1; softmax(Z, -1)
    Returns the padded output; caller slices [:n, :num_classes].
    """
    z = _gcn_layer(a_p, x_p, w0_p, activation="relu", valid_cols=None,
                   out_dtype=compute_dtype, compute_dtype=compute_dtype)
    for wh in wh_p:
        z = _gcn_layer(a_p, z, wh, activation="relu", valid_cols=None,
                       out_dtype=compute_dtype, compute_dtype=compute_dtype)
    z = _gcn_layer(a_p, z, w1_p, activation="softmax", valid_cols=num_classes,
                   out_dtype=jnp.float32, compute_dtype=compute_dtype)
    return z


def gcn_forward(a_hat, x, w0, w_hidden, w1, *, compute_dtype=jnp.bfloat16):
    """Convenience wrapper: pad once (outside the jitted hot path), run, slice."""
    args, (n, f) = prepare_gcn_inputs(a_hat, x, w0, w_hidden, w1,
                                      compute_dtype=compute_dtype)
    fwd = jax.jit(functools.partial(gcn_forward_padded, num_classes=f,
                                    compute_dtype=compute_dtype))
    return fwd(*args)[:n, :f]


# ----------------------- reference (plain JAX) -----------------------
def gcn_forward_ref(a_hat, x, w0, w_hidden, w1):
    z = jnp.maximum(a_hat @ (x @ w0), 0.0)
    for wh in w_hidden:
        z = jnp.maximum(a_hat @ (z @ wh), 0.0)
    z = a_hat @ (z @ w1)
    return jax.nn.softmax(z, axis=-1)


# ----------------------- deterministic setup -----------------------
def xavier_normal(key, fan_in, fan_out):
    std = (2.0 / (fan_in + fan_out)) ** 0.5
    # stored as [in, out] so that X @ W == torch Linear(X)
    return std * jax.random.normal(key, (fan_in, fan_out), dtype=jnp.float32)


def build_a_hat(key, n):
    """Random symmetric adjacency + self loops + renormalization trick."""
    a = (jax.random.uniform(key, (n, n)) < 0.1).astype(jnp.float32)
    a = jnp.maximum(a, a.T)
    a = a + jnp.eye(n, dtype=jnp.float32)
    a = jnp.minimum(a, 1.0)
    d = jnp.sum(a, axis=-1)
    d_inv_sqrt = 1.0 / jnp.sqrt(d)
    return a * d_inv_sqrt[:, None] * d_inv_sqrt[None, :]


if __name__ == "__main__":
    # small shapes: N nodes, C input feats, H hidden feats, F output classes
    N, C, H, F = 64, 32, 32, 8
    num_layers = 3  # -> one hidden Wh layer

    key = jax.random.PRNGKey(0)
    k_a, k_x, k_w0, k_wh, k_w1 = jax.random.split(key, 5)

    a_hat = build_a_hat(k_a, N)
    x = jax.random.normal(k_x, (N, C), dtype=jnp.float32)

    w0 = xavier_normal(k_w0, C, H)
    w_hidden = [xavier_normal(k, H, H) for k in jax.random.split(k_wh, num_layers - 2)]
    w1 = xavier_normal(k_w1, H, F)

    ref = gcn_forward_ref(a_hat, x, w0, w_hidden, w1)

    # float32 compute path: tight numerical check (padding hoisted, forward jitted once)
    args_f32, (n, f) = prepare_gcn_inputs(a_hat, x, w0, w_hidden, w1,
                                          compute_dtype=jnp.float32)
    fwd_f32 = jax.jit(functools.partial(gcn_forward_padded, num_classes=f,
                                        compute_dtype=jnp.float32))
    out_f32 = jax.block_until_ready(fwd_f32(*args_f32))[:n, :f]
    assert out_f32.shape == (N, F)
    assert jnp.allclose(jnp.sum(out_f32, axis=-1), 1.0, atol=1e-4)
    assert jnp.allclose(out_f32, ref, atol=1e-4, rtol=1e-4)

    # bfloat16 compute path (production config): relaxed check
    args_bf16, _ = prepare_gcn_inputs(a_hat, x, w0, w_hidden, w1,
                                      compute_dtype=jnp.bfloat16)
    fwd_bf16 = jax.jit(functools.partial(gcn_forward_padded, num_classes=f,
                                         compute_dtype=jnp.bfloat16))
    out_bf16 = jax.block_until_ready(fwd_bf16(*args_bf16))[:n, :f]
    assert out_bf16.shape == (N, F)
    assert jnp.allclose(jnp.sum(out_bf16, axis=-1), 1.0, atol=5e-3)
    assert jnp.allclose(out_bf16, ref, atol=2.5e-2, rtol=2.5e-2)

    print("KERNEL_OK")
</pallas_src>

<mosaic_0001>
module attributes {stable_mosaic.version = 11 : i64} {
  func.func @_aggregate_kernel(%arg0: i32, %arg1: i32, %arg2: memref<128x128xf32, #tpu.memory_space<vmem>>, %arg3: memref<128x128xf32, #tpu.memory_space<vmem>>, %arg4: memref<128x128xf32, #tpu.memory_space<vmem>>, %arg5: memref<128x128xf32, #tpu.memory_space<vmem>>) attributes {dimension_semantics = [#tpu.dimension_semantics<parallel>, #tpu.dimension_semantics<arbitrary>], iteration_bounds = array<i64: 1, 1>, scalar_prefetch = 0 : i64, scratch_operands = 1 : i64, tpu.core_type = #tpu.core_type<tc>, window_params = [{transform_indices = @transform_0, window_bounds = array<i64: 128, 128>}, {pipeline_mode = #tpu.pipeline_mode<synchronous>, transform_indices = @transform_1, window_bounds = array<i64: 128, 128>}, {transform_indices = @transform_2, window_bounds = array<i64: 128, 128>}]} {
    %c128_i32 = arith.constant 128 : i32
    %0 = arith.muli %arg1, %c128_i32 : i32
    %1 = tpu.assume_multiple %0, 128 : i32
    %2 = arith.index_cast %1 : i32 to index
    %c0 = arith.constant 0 : index
    %3 = vector.load %arg3[%2, %c0] : memref<128x128xf32, #tpu.memory_space<vmem>>, vector<128x128xf32>
    %c0_0 = arith.constant 0 : index
    %c0_1 = arith.constant 0 : index
    %4 = vector.load %arg2[%c0_0, %c0_1] : memref<128x128xf32, #tpu.memory_space<vmem>>, vector<128x128xf32>
    %cst = arith.constant dense<0.000000e+00> : vector<128x128xf32>
    %5 = tpu.matmul %4, %3, %cst {dimension_numbers = #tpu.dot_dimension_numbers<[1], [0], [0], [1], [0, 0, 1, 1], [], []>} : vector<128x128xf32>, vector<128x128xf32>, vector<128x128xf32> -> vector<128x128xf32>
    %c0_i32 = arith.constant 0 : i32
    %6 = arith.cmpi eq, %arg1, %c0_i32 : i32
    %7 = arith.extui %6 : i1 to i32
    %c0_i32_2 = arith.constant 0 : i32
    %8 = arith.cmpi ne, %7, %c0_i32_2 : i32
    scf.if %8 {
      %c0_7 = arith.constant 0 : index
      %c0_8 = arith.constant 0 : index
      %15 = vector.load %arg5[%c0_7, %c0_8] : memref<128x128xf32, #tpu.memory_space<vmem>>, vector<128x128xf32>
      tpu.vector_store %arg5[%c0_7, %c0_8], %5 {strides = array<i32>} : memref<128x128xf32, #tpu.memory_space<vmem>>, vector<128x128xf32>,
    } else {
    }
    %c0_i32_3 = arith.constant 0 : i32
    %9 = arith.cmpi sgt, %arg1, %c0_i32_3 : i32
    %10 = arith.extui %9 : i1 to i32
    %c0_i32_4 = arith.constant 0 : i32
    %11 = arith.cmpi ne, %10, %c0_i32_4 : i32
    scf.if %11 {
      %c0_7 = arith.constant 0 : index
      %c0_8 = arith.constant 0 : index
      %15 = vector.load %arg5[%c0_7, %c0_8] : memref<128x128xf32, #tpu.memory_space<vmem>>, vector<128x128xf32>
      %16 = arith.addf %15, %5 : vector<128x128xf32>
      %c0_9 = arith.constant 0 : index
      %c0_10 = arith.constant 0 : index
      %17 = vector.load %arg5[%c0_9, %c0_10] : memref<128x128xf32, #tpu.memory_space<vmem>>, vector<128x128xf32>
      tpu.vector_store %arg5[%c0_9, %c0_10], %16 {strides = array<i32>} : memref<128x128xf32, #tpu.memory_space<vmem>>, vector<128x128xf32>,
    } else {
    }
    %c0_i32_5 = arith.constant 0 : i32
    %12 = arith.cmpi eq, %arg1, %c0_i32_5 : i32
    %13 = arith.extui %12 : i1 to i32
    %c0_i32_6 = arith.constant 0 : i32
    %14 = arith.cmpi ne, %13, %c0_i32_6 : i32
    scf.if %14 {
      %c0_7 = arith.constant 0 : index
      %c0_8 = arith.constant 0 : index
      %15 = vector.load %arg5[%c0_7, %c0_8] : memref<128x128xf32, #tpu.memory_space<vmem>>, vector<128x128xf32>
      %cst_9 = arith.constant 0.000000e+00 : f32
      %16 = vector.broadcast %cst_9 : f32 to vector<128x128xf32>
      %17 = arith.maximumf %15, %16 : vector<128x128xf32>
      %c0_10 = arith.constant 0 : index
      %c0_11 = arith.constant 0 : index
      %18 = vector.load %arg4[%c0_10, %c0_11] : memref<128x128xf32, #tpu.memory_space<vmem>>, vector<128x128xf32>
      tpu.vector_store %arg4[%c0_10, %c0_11], %17 {strides = array<i32>} : memref<128x128xf32, #tpu.memory_space<vmem>>, vector<128x128xf32>,
    } else {
    }
    return
  }
  func.func @transform_0(%arg0: i32, %arg1: i32) -> (i32, i32) {
    %c0_i32 = arith.constant 0 : i32
    return %arg0, %arg1 : i32, i32
  }
  func.func @transform_1(%arg0: i32, %arg1: i32) -> (i32, i32) {
    %c0_i32 = arith.constant 0 : i32
    %c0_i32_0 = arith.constant 0 : i32
    %c0_i32_1 = arith.constant 0 : i32
    return %c0_i32, %c0_i32_0 : i32, i32
  }
  func.func @transform_2(%arg0: i32, %arg1: i32) -> (i32, i32) {
    %c0_i32 = arith.constant 0 : i32
    %c0_i32_0 = arith.constant 0 : i32
    return %arg0, %c0_i32 : i32, i32
  }
}

module attributes {stable_mosaic.version = 11 : i64} {
  func.func @_xw_kernel(%arg0: i32, %arg1: memref<128x128xf32, #tpu.memory_space<vmem>>, %arg2: memref<128x128xf32, #tpu.memory_space<vmem>>, %arg3: memref<128x128xf32, #tpu.memory_space<vmem>>) attributes {dimension_semantics = [#tpu.dimension_semantics<parallel>], iteration_bounds = array<i64: 1>, scalar_prefetch = 0 : i64, scratch_operands = 0 : i64, tpu.core_type = #tpu.core_type<tc>, window_params = [{transform_indices = @transform_0, window_bounds = array<i64: 128, 128>}, {pipeline_mode = #tpu.pipeline_mode<synchronous>, transform_indices = @transform_1, window_bounds = array<i64: 128, 128>}, {transform_indices = @transform_2, window_bounds = array<i64: 128, 128>}]} {
    %c0 = arith.constant 0 : index
    %c0_0 = arith.constant 0 : index
    %0 = vector.load %arg1[%c0, %c0_0] : memref<128x128xf32, #tpu.memory_space<vmem>>, vector<128x128xf32>
    %c0_1 = arith.constant 0 : index
    %c0_2 = arith.constant 0 : index
    %1 = vector.load %arg2[%c0_1, %c0_2] : memref<128x128xf32, #tpu.memory_space<vmem>>, vector<128x128xf32>
    %cst = arith.constant dense<0.000000e+00> : vector<128x128xf32>
    %2 = tpu.matmul %0, %1, %cst {dimension_numbers = #tpu.dot_dimension_numbers<[1], [0], [0], [1], [0, 0, 1, 1], [], []>} : vector<128x128xf32>, vector<128x128xf32>, vector<128x128xf32> -> vector<128x128xf32>
    %c0_3 = arith.constant 0 : index
    %c0_4 = arith.constant 0 : index
    %3 = vector.load %arg3[%c0_3, %c0_4] : memref<128x128xf32, #tpu.memory_space<vmem>>, vector<128x128xf32>
    tpu.vector_store %arg3[%c0_3, %c0_4], %2 {strides = array<i32>} : memref<128x128xf32, #tpu.memory_space<vmem>>, vector<128x128xf32>,
    return
  }
  func.func @transform_0(%arg0: i32) -> (i32, i32) {
    %c0_i32 = arith.constant 0 : i32
    %c0_i32_0 = arith.constant 0 : i32
    return %arg0, %c0_i32 : i32, i32
  }
  func.func @transform_1(%arg0: i32) -> (i32, i32) {
    %c0_i32 = arith.constant 0 : i32
    %c0_i32_0 = arith.constant 0 : i32
    %c0_i32_1 = arith.constant 0 : i32
    return %c0_i32, %c0_i32_0 : i32, i32
  }
  func.func @transform_2(%arg0: i32) -> (i32, i32) {
    %c0_i32 = arith.constant 0 : i32
    %c0_i32_0 = arith.constant 0 : i32
    return %arg0, %c0_i32 : i32, i32
  }
}

module attributes {stable_mosaic.version = 11 : i64} {
  func.func @_xw_kernel(%arg0: i32, %arg1: memref<128x128xf32, #tpu.memory_space<vmem>>, %arg2: memref<128x128xf32, #tpu.memory_space<vmem>>, %arg3: memref<128x128xf32, #tpu.memory_space<vmem>>) attributes {dimension_semantics = [#tpu.dimension_semantics<parallel>], iteration_bounds = array<i64: 1>, scalar_prefetch = 0 : i64, scratch_operands = 0 : i64, tpu.core_type = #tpu.core_type<tc>, window_params = [{transform_indices = @transform_0, window_bounds = array<i64: 128, 128>}, {pipeline_mode = #tpu.pipeline_mode<synchronous>, transform_indices = @transform_1, window_bounds = array<i64: 128, 128>}, {transform_indices = @transform_2, window_bounds = array<i64: 128, 128>}]} {
    %c0 = arith.constant 0 : index
    %c0_0 = arith.constant 0 : index
    %0 = vector.load %arg1[%c0, %c0_0] : memref<128x128xf32, #tpu.memory_space<vmem>>, vector<128x128xf32>
    %c0_1 = arith.constant 0 : index
    %c0_2 = arith.constant 0 : index
    %1 = vector.load %arg2[%c0_1, %c0_2] : memref<128x128xf32, #tpu.memory_space<vmem>>, vector<128x128xf32>
    %cst = arith.constant dense<0.000000e+00> : vector<128x128xf32>
    %2 = tpu.matmul %0, %1, %cst {dimension_numbers = #tpu.dot_dimension_numbers<[1], [0], [0], [1], [0, 0, 1, 1], [], []>} : vector<128x128xf32>, vector<128x128xf32>, vector<128x128xf32> -> vector<128x128xf32>
    %c0_3 = arith.constant 0 : index
    %c0_4 = arith.constant 0 : index
    %3 = vector.load %arg3[%c0_3, %c0_4] : memref<128x128xf32, #tpu.memory_space<vmem>>, vector<128x128xf32>
    tpu.vector_store %arg3[%c0_3, %c0_4], %2 {strides = array<i32>} : memref<128x128xf32, #tpu.memory_space<vmem>>, vector<128x128xf32>,
    return
  }
  func.func @transform_0(%arg0: i32) -> (i32, i32) {
    %c0_i32 = arith.constant 0 : i32
    %c0_i32_0 = arith.constant 0 : i32
    return %arg0, %c0_i32 : i32, i32
  }
  func.func @transform_1(%arg0: i32) -> (i32, i32) {
    %c0_i32 = arith.constant 0 : i32
    %c0_i32_0 = arith.constant 0 : i32
    %c0_i32_1 = arith.constant 0 : i32
    return %c0_i32, %c0_i32_0 : i32, i32
  }
  func.func @transform_2(%arg0: i32) -> (i32, i32) {
    %c0_i32 = arith.constant 0 : i32
    %c0_i32_0 = arith.constant 0 : i32
    return %arg0, %c0_i32 : i32, i32
  }
}

module attributes {stable_mosaic.version = 11 : i64} {
  func.func @_aggregate_kernel(%arg0: i32, %arg1: i32, %arg2: memref<128x128xf32, #tpu.memory_space<vmem>>, %arg3: memref<128x128xf32, #tpu.memory_space<vmem>>, %arg4: memref<128x128xf32, #tpu.memory_space<vmem>>, %arg5: memref<128x128xf32, #tpu.memory_space<vmem>>) attributes {dimension_semantics = [#tpu.dimension_semantics<parallel>, #tpu.dimension_semantics<arbitrary>], iteration_bounds = array<i64: 1, 1>, scalar_prefetch = 0 : i64, scratch_operands = 1 : i64, tpu.core_type = #tpu.core_type<tc>, window_params = [{transform_indices = @transform_0, window_bounds = array<i64: 128, 128>}, {pipeline_mode = #tpu.pipeline_mode<synchronous>, transform_indices = @transform_1, window_bounds = array<i64: 128, 128>}, {transform_indices = @transform_2, window_bounds = array<i64: 128, 128>}]} {
    %c128_i32 = arith.constant 128 : i32
    %0 = arith.muli %arg1, %c128_i32 : i32
    %1 = tpu.assume_multiple %0, 128 : i32
    %2 = arith.index_cast %1 : i32 to index
    %c0 = arith.constant 0 : index
    %3 = vector.load %arg3[%2, %c0] : memref<128x128xf32, #tpu.memory_space<vmem>>, vector<128x128xf32>
    %c0_0 = arith.constant 0 : index
    %c0_1 = arith.constant 0 : index
    %4 = vector.load %arg2[%c0_0, %c0_1] : memref<128x128xf32, #tpu.memory_space<vmem>>, vector<128x128xf32>
    %cst = arith.constant dense<0.000000e+00> : vector<128x128xf32>
    %5 = tpu.matmul %4, %3, %cst {dimension_numbers = #tpu.dot_dimension_numbers<[1], [0], [0], [1], [0, 0, 1, 1], [], []>} : vector<128x128xf32>, vector<128x128xf32>, vector<128x128xf32> -> vector<128x128xf32>
    %c0_i32 = arith.constant 0 : i32
    %6 = arith.cmpi eq, %arg1, %c0_i32 : i32
    %7 = arith.extui %6 : i1 to i32
    %c0_i32_2 = arith.constant 0 : i32
    %8 = arith.cmpi ne, %7, %c0_i32_2 : i32
    scf.if %8 {
      %c0_7 = arith.constant 0 : index
      %c0_8 = arith.constant 0 : index
      %15 = vector.load %arg5[%c0_7, %c0_8] : memref<128x128xf32, #tpu.memory_space<vmem>>, vector<128x128xf32>
      tpu.vector_store %arg5[%c0_7, %c0_8], %5 {strides = array<i32>} : memref<128x128xf32, #tpu.memory_space<vmem>>, vector<128x128xf32>,
    } else {
    }
    %c0_i32_3 = arith.constant 0 : i32
    %9 = arith.cmpi sgt, %arg1, %c0_i32_3 : i32
    %10 = arith.extui %9 : i1 to i32
    %c0_i32_4 = arith.constant 0 : i32
    %11 = arith.cmpi ne, %10, %c0_i32_4 : i32
    scf.if %11 {
      %c0_7 = arith.constant 0 : index
      %c0_8 = arith.constant 0 : index
      %15 = vector.load %arg5[%c0_7, %c0_8] : memref<128x128xf32, #tpu.memory_space<vmem>>, vector<128x128xf32>
      %16 = arith.addf %15, %5 : vector<128x128xf32>
      %c0_9 = arith.constant 0 : index
      %c0_10 = arith.constant 0 : index
      %17 = vector.load %arg5[%c0_9, %c0_10] : memref<128x128xf32, #tpu.memory_space<vmem>>, vector<128x128xf32>
      tpu.vector_store %arg5[%c0_9, %c0_10], %16 {strides = array<i32>} : memref<128x128xf32, #tpu.memory_space<vmem>>, vector<128x128xf32>,
    } else {
    }
    %c0_i32_5 = arith.constant 0 : i32
    %12 = arith.cmpi eq, %arg1, %c0_i32_5 : i32
    %13 = arith.extui %12 : i1 to i32
    %c0_i32_6 = arith.constant 0 : i32
    %14 = arith.cmpi ne, %13, %c0_i32_6 : i32
    scf.if %14 {
      %c0_7 = arith.constant 0 : index
      %c0_8 = arith.constant 0 : index
      %15 = vector.load %arg5[%c0_7, %c0_8] : memref<128x128xf32, #tpu.memory_space<vmem>>, vector<128x128xf32>
      %16 = tpu.iota {dimensions = array<i32: 1>} : vector<128x128xi32>
      %c8_i32 = arith.constant 8 : i32
      %17 = vector.broadcast %c8_i32 : i32 to vector<128x128xi32>
      %18 = arith.cmpi slt, %16, %17 : vector<128x128xi32>
      %cst_9 = arith.constant -1.000000e+30 : f32
      %19 = vector.broadcast %cst_9 : f32 to vector<128x128xf32>
      %20 = arith.select %18, %15, %19 : vector<128x128xi1>, vector<128x128xf32>
      %cst_10 = arith.constant dense<0xFF800000> : vector<128xf32>
      %21 = vector.multi_reduction <maximumf>, %20, %cst_10 [1] : vector<128x128xf32> to vector<128xf32>
      %22 = vector.shape_cast %21 : vector<128xf32> to vector<128x1xf32>
      %23 = vector.broadcast %22 : vector<128x1xf32> to vector<128x128xf32>
      %24 = arith.subf %20, %23 : vector<128x128xf32>
      %25 = math.exp %24 : vector<128x128xf32>
      %cst_11 = arith.constant dense<0.000000e+00> : vector<128xf32>
      %26 = vector.multi_reduction <add>, %25, %cst_11 [1] : vector<128x128xf32> to vector<128xf32>
      %27 = vector.shape_cast %26 : vector<128xf32> to vector<128x1xf32>
      %28 = vector.broadcast %27 : vector<128x1xf32> to vector<128x128xf32>
      %29 = arith.divf %25, %28 : vector<128x128xf32>
      %c0_12 = arith.constant 0 : index
      %c0_13 = arith.constant 0 : index
      %30 = vector.load %arg4[%c0_12, %c0_13] : memref<128x128xf32, #tpu.memory_space<vmem>>, vector<128x128xf32>
      tpu.vector_store %arg4[%c0_12, %c0_13], %29 {strides = array<i32>} : memref<128x128xf32, #tpu.memory_space<vmem>>, vector<128x128xf32>,
    } else {
    }
    return
  }
  func.func @transform_0(%arg0: i32, %arg1: i32) -> (i32, i32) {
    %c0_i32 = arith.constant 0 : i32
    return %arg0, %arg1 : i32, i32
  }
  func.func @transform_1(%arg0: i32, %arg1: i32) -> (i32, i32) {
    %c0_i32 = arith.constant 0 : i32
    %c0_i32_0 = arith.constant 0 : i32
    %c0_i32_1 = arith.constant 0 : i32
    return %c0_i32, %c0_i32_0 : i32, i32
  }
  func.func @transform_2(%arg0: i32, %arg1: i32) -> (i32, i32) {
    %c0_i32 = arith.constant 0 : i32
    %c0_i32_0 = arith.constant 0 : i32
    return %arg0, %c0_i32 : i32, i32
  }
}

</mosaic_0001>

<bundles_post_ra>
// kernel: gcn_forward_padded.8
= control target key start
LH: loop header
LB: loop body
LE: loop exit
PB: predicated region body
PF: predicated region fallthrough
CT: control target
= control target key end

     0   :  { %s503_s1 = inlined_call_operand.vmem [shape: f32[128,128], index: 1, kind: input, shape index: {}]   ;;  %s504_s0 = inlined_call_operand.vmem [shape: f32[128,128], index: 0, kind: input, shape index: {}]   ;;  %s505_s2 = inlined_call_operand.vmem [shape: f32[128,128], index: 2, kind: output, shape index: {}]  }
   0x1   :  { %v27_v0 = vld [vmem:[%s503_s1] sm:$0xff]  ;;  %v28_v1 = vld [vmem:[%s503_s1 + $0x8] sm:$0xff]  ;;  %v29_v2 = vld [vmem:[%s503_s1 + $0x10] sm:$0xff] }
   0x2   :  { %v296_v3 = vpack.c.bf16 %v28_v1, %v27_v0  ;;  %v30_v4 = vld [vmem:[%s503_s1 + $0x18] sm:$0xff]  ;;  %v31_v6 = vld [vmem:[%s503_s1 + $0x20] sm:$0xff]  ;;  %v32_v7 = vld [vmem:[%s503_s1 + $0x28] sm:$0xff] }
   0x3   :  { %v300_v5 = vpack.c.bf16 %v30_v4, %v29_v2  ;;  %v304_v8 = vpack.c.bf16 %v32_v7, %v31_v6  ;;  %v11_v9 = vld [vmem:[%s504_s0] sm:$0xff]  ;;  %v33_v11 = vld [vmem:[%s503_s1 + $0x30] sm:$0xff]  ;;  %v34_v12 = vld [vmem:[%s503_s1 + $0x38] sm:$0xff] }
   0x4   :  { %297 = vmatprep.subr.bf16.mxu0 %v296_v3  ;;  %328 = vmatprep.subr.bf16.mxu1 %v296_v3  ;;  %v19_v10 = vld [vmem:[%s504_s0 + $0x40] sm:$0xff]  ;;  %v308_v13 = vpack.c.bf16 %v34_v12, %v33_v11  ;;  %v36_v15 = vld [vmem:[%s503_s1 + $0x48] sm:$0xff]  ;;  %v37_v17 = vld [vmem:[%s503_s1 + $0x50] sm:$0xff] }
   0x5   :  { %299 = vmatpush3.bf16.msra.mxu0 %v296_v3  ;;  %336 = vmatpush3.bf16.msra.mxu1 %v296_v3  ;;  %v35_v14 = vld [vmem:[%s503_s1 + $0x40] sm:$0xff]  ;;  %v38_v18 = vld [vmem:[%s503_s1 + $0x58] sm:$0xff]  ;;  %v40_v21 = vld [vmem:[%s503_s1 + $0x68] sm:$0xff] }
   0x6   :  { %301 = vmatprep.subr.bf16.mxu0 %v300_v5  ;;  %329 = vmatprep.subr.bf16.mxu1 %v300_v5  ;;  %v312_v16 = vpack.c.bf16 %v36_v15, %v35_v14  ;;  %v316_v19 = vpack.c.bf16 %v38_v18, %v37_v17  ;;  %v39_v20 = vld [vmem:[%s503_s1 + $0x60] sm:$0xff]  ;;  %v41_v23 = vld [vmem:[%s503_s1 + $0x70] sm:$0xff]  ;;  %v42_v24 = vld [vmem:[%s503_s1 + $0x78] sm:$0xff] }
   0x7   :  { %272 = vmatprep.mubr.f32.mxu0 %v11_v9  ;;  %284 = vmatprep.mubr.f32.mxu1 %v19_v10  ;;  %v320_v22 = vpack.c.bf16 %v40_v21, %v39_v20  ;;  %v324_v25 = vpack.c.bf16 %v42_v24, %v41_v23  ;;  %v12_v26 = vld [vmem:[%s504_s0 + $0x8] sm:$0xff]  ;;  %v13_v28 = vld [vmem:[%s504_s0 + $0x10] sm:$0xff]  ;;  %v14_v30 = vld [vmem:[%s504_s0 + $0x18] sm:$0xff] }
   0x8   :  { %v20_v27 = vld [vmem:[%s504_s0 + $0x48] sm:$0xff]  ;;  %v21_v29 = vld [vmem:[%s504_s0 + $0x50] sm:$0xff]  ;;  %v22_v31 = vld [vmem:[%s504_s0 + $0x58] sm:$0xff] }
   0x9   :  { %303 = vmatpush3.bf16.msra.mxu0 %v300_v5  ;;  %337 = vmatpush3.bf16.msra.mxu1 %v300_v5  ;;  %v15_v32 = vld [vmem:[%s504_s0 + $0x20] sm:$0xff]  ;;  %v16_v34 = vld [vmem:[%s504_s0 + $0x28] sm:$0xff]  ;;  %v17_v36 = vld [vmem:[%s504_s0 + $0x30] sm:$0xff] }
   0xa   :  { %305 = vmatprep.subr.bf16.mxu0 %v304_v8  ;;  %330 = vmatprep.subr.bf16.mxu1 %v304_v8  ;;  %v23_v33 = vld [vmem:[%s504_s0 + $0x60] sm:$0xff]  ;;  %v24_v35 = vld [vmem:[%s504_s0 + $0x68] sm:$0xff]  ;;  %v25_v37 = vld [vmem:[%s504_s0 + $0x70] sm:$0xff] }
   0xb   :  { %v18_v38 = vld [vmem:[%s504_s0 + $0x38] sm:$0xff] }
   0xc   :  { %v26_v39 = vld [vmem:[%s504_s0 + $0x78] sm:$0xff] }
   0xd   :  { %307 = vmatpush3.bf16.msra.mxu0 %v304_v8  ;;  %338 = vmatpush3.bf16.msra.mxu1 %v304_v8 }
   0xe   :  { %309 = vmatprep.subr.bf16.mxu0 %v308_v13  ;;  %331 = vmatprep.subr.bf16.mxu1 %v308_v13 }
  0x11   :  { %311 = vmatpush3.bf16.msra.mxu0 %v308_v13  ;;  %339 = vmatpush3.bf16.msra.mxu1 %v308_v13 }
  0x12   :  { %313 = vmatprep.subr.bf16.mxu0 %v312_v16  ;;  %332 = vmatprep.subr.bf16.mxu1 %v312_v16 }
  0x15   :  { %315 = vmatpush3.bf16.msra.mxu0 %v312_v16  ;;  %340 = vmatpush3.bf16.msra.mxu1 %v312_v16 }
  0x16   :  { %317 = vmatprep.subr.bf16.mxu0 %v316_v19  ;;  %333 = vmatprep.subr.bf16.mxu1 %v316_v19 }
  0x19   :  { %319 = vmatpush3.bf16.msra.mxu0 %v316_v19  ;;  %341 = vmatpush3.bf16.msra.mxu1 %v316_v19 }
  0x1a   :  { %321 = vmatprep.subr.bf16.mxu0 %v320_v22  ;;  %334 = vmatprep.subr.bf16.mxu1 %v320_v22 }
  0x1d   :  { %323 = vmatpush3.bf16.msra.mxu0 %v320_v22  ;;  %342 = vmatpush3.bf16.msra.mxu1 %v320_v22 }
  0x1e   :  { %325 = vmatprep.subr.bf16.mxu0 %v324_v25  ;;  %335 = vmatprep.subr.bf16.mxu1 %v324_v25 }
  0x21   :  { %327 = vmatpush3.bf16.msra.mxu0 %v324_v25  ;;  %343 = vmatpush3.bf16.msra.mxu1 %v324_v25 }
  0x24   :  { %273 = vmatmul.mubr.f32.vlgmr.msra.gmra.mrb[0].mxu0 %v12_v26  ;;  %285 = vmatmul.mubr.f32.vlgmr.msra.gmra.mrb[0].mxu1 %v20_v27 }
  0x25   :  { %275 = vmatprep.mubr.f32.mxu0 %v13_v28  ;;  %287 = vmatprep.mubr.f32.mxu1 %v21_v29 }
  0x28   :  { %276 = vmatmul.mubr.f32.gmra.mrb[2].mxu0 %v14_v30  ;;  %288 = vmatmul.mubr.f32.gmra.mrb[2].mxu1 %v22_v31 }
  0x29   :  { %278 = vmatprep.mubr.f32.mxu0 %v15_v32  ;;  %290 = vmatprep.mubr.f32.mxu1 %v23_v33 }
  0x2c   :  { %279 = vmatmul.mubr.f32.gmra.mrb[4].mxu0 %v16_v34  ;;  %291 = vmatmul.mubr.f32.gmra.mrb[4].mxu1 %v24_v35 }
  0x2d   :  { %281 = vmatprep.mubr.f32.mxu0 %v17_v36  ;;  %293 = vmatprep.mubr.f32.mxu1 %v25_v37 }
  0x30   :  { %282 = vmatmul.mubr.f32.gmra.mrb[6].mxu0 %v18_v38  ;;  %294 = vmatmul.mubr.f32.gmra.mrb[6].mxu1 %v26_v39 }
  0xf7   :  { %v274_v40 = vpop.f32.mrb[0].mxu0  ;;  %v286_v41 = vpop.f32.mrb[0].mxu1 }
  0xf8   :  { %189 = vst [vmem:[%s505_s2 + $0x8] sm:$0xff] %v274_v40  ;;  %197 = vst [vmem:[%s505_s2 + $0x48] sm:$0xff] %v286_v41  ;;  %v109_v42 = vpop.f32.mrb[1].mxu0  ;;  %v149_v43 = vpop.f32.mrb[1].mxu1 }
  0xf9   :  { %188 = vst [vmem:[%s505_s2] sm:$0xff] %v109_v42  ;;  %196 = vst [vmem:[%s505_s2 + $0x40] sm:$0xff] %v149_v43 }
  0xfb   :  { %v277_v44 = vpop.f32.mrb[2].mxu0  ;;  %v289_v45 = vpop.f32.mrb[2].mxu1 }
  0xfc   :  { %191 = vst [vmem:[%s505_s2 + $0x18] sm:$0xff] %v277_v44  ;;  %199 = vst [vmem:[%s505_s2 + $0x58] sm:$0xff] %v289_v45  ;;  %v119_v46 = vpop.f32.mrb[3].mxu0  ;;  %v159_v47 = vpop.f32.mrb[3].mxu1 }
  0xfd   :  { %190 = vst [vmem:[%s505_s2 + $0x10] sm:$0xff] %v119_v46  ;;  %198 = vst [vmem:[%s505_s2 + $0x50] sm:$0xff] %v159_v47 }
  0xff   :  { %v280_v48 = vpop.f32.mrb[4].mxu0  ;;  %v292_v49 = vpop.f32.mrb[4].mxu1 }
 0x100   :  { %193 = vst [vmem:[%s505_s2 + $0x28] sm:$0xff] %v280_v48  ;;  %201 = vst [vmem:[%s505_s2 + $0x68] sm:$0xff] %v292_v49  ;;  %v129_v50 = vpop.f32.mrb[5].mxu0  ;;  %v169_v51 = vpop.f32.mrb[5].mxu1 }
 0x101   :  { %192 = vst [vmem:[%s505_s2 + $0x20] sm:$0xff] %v129_v50  ;;  %200 = vst [vmem:[%s505_s2 + $0x60] sm:$0xff] %v169_v51 }
 0x103   :  { %v283_v52 = vpop.f32.mrb[6].mxu0  ;;  %v295_v53 = vpop.f32.mrb[6].mxu1 }
 0x104   :  { %195 = vst [vmem:[%s505_s2 + $0x38] sm:$0xff] %v283_v52  ;;  %203 = vst [vmem:[%s505_s2 + $0x78] sm:$0xff] %v295_v53  ;;  %v139_v54 = vpop.f32.mrb[7].mxu0  ;;  %v179_v55 = vpop.f32.mrb[7].mxu1 }
 0x105   :  { %194 = vst [vmem:[%s505_s2 + $0x30] sm:$0xff] %v139_v54  ;;  %202 = vst [vmem:[%s505_s2 + $0x70] sm:$0xff] %v179_v55 }

// kernel: gcn_forward_padded.6
= control target key start
LH: loop header
LB: loop body
LE: loop exit
PB: predicated region body
PF: predicated region fallthrough
CT: control target
= control target key end

     0   :  { %7 = vsyncpa [#allocation3], 0  ;;  %s517_s0 = inlined_call_operand.hbm [shape: f32[128,128], index: 0, kind: input, shape index: {}]   ;;  %s518_s1 = inlined_call_operand.hbm [shape: f32[128,128], index: 1, kind: input, shape index: {}]   ;;  %s519_s2 = inlined_call_operand.vmem [shape: f32[128,128], index: 2, kind: output, shape index: {}]  }
   0x1   :  { %8 = vsyncpa [#allocation5], 0  ;;  %s426_s9 = smov [#allocation2]   ;;  %s378_s13 = scalar_lea.hbm %s517_s0, 2048 }
   0x2   :  { %s14_s10 = sshll.u32 %s426_s9, 4  ;;  %p379_p0 = scmp.ne.s32.totalorder %s517_s0, %s378_s13  ;;  %s15_s10 = int_to_ptr.vmem [resolvable:$true] %s14_s10 }
   0x3   :  { %p382_p1 = scmp.lt.u32.totalorder %s378_s13, %s517_s0 }
   0x5   :  { %p384_p2 = pnand %p382_p1, %p379_p0 }
   0x7   :  { %387 = shalt.err (!%p384_p2)
}
   0x8   :  { %s388_s18 = scalar_lea.vmem %s15_s10, 2048  ;;  %p393_p4 = scmp.lt.s32.totalorder %s15_s10, %s15_s10 }
   0x9   :  { %p389_p3 = scmp.ne.s32.totalorder %s15_s10, %s388_s18  ;;  %p394_p5 = scmp.lt.s32.totalorder %s388_s18, %s388_s18 }
   0xb   :  { %p395_p6 = por %p394_p5, %p393_p4 }
   0xd   :  { %p396_p7 = pnand %p395_p6, %p389_p3 }
   0xf   :  { %399 = shalt.err (!%p396_p7)
}
  0x10   :  { %s427_s19 = smov 128   ;;  %s428_s20 = smov 8  }
  0x11   :  { %20 = dma.hbm_to_vmem [thread:$0]  %s517_s0, 2048, %s15_s10, [#allocation3], %s427_s19, %s427_s19, %s428_s20  }
  0x12   :  { %s429_s23 = smov [#allocation4]   ;;  %s400_s27 = scalar_lea.hbm %s518_s1, 2048 }
  0x13   :  { %s26_s24 = sshll.u32 %s429_s23, 4  ;;  %p401_p8 = scmp.ne.s32.totalorder %s518_s1, %s400_s27  ;;  %s27_s24 = int_to_ptr.vmem [resolvable:$true] %s26_s24 }
  0x14   :  { %p404_p9 = scmp.lt.u32.totalorder %s400_s27, %s518_s1 }
  0x16   :  { %p406_p10 = pnand %p404_p9, %p401_p8 }
  0x18   :  { %409 = shalt.err (!%p406_p10)
}
  0x19   :  { %s410_s4 = scalar_lea.vmem %s27_s24, 2048  ;;  %p415_p12 = scmp.lt.s32.totalorder %s27_s24, %s27_s24 }
  0x1a   :  { %p411_p11 = scmp.ne.s32.totalorder %s27_s24, %s410_s4  ;;  %p416_p13 = scmp.lt.s32.totalorder %s410_s4, %s410_s4 }
  0x1c   :  { %p417_p0 = por %p416_p13, %p415_p12 }
  0x1e   :  { %p418_p1 = pnand %p417_p0, %p411_p11 }
  0x20   :  { %421 = shalt.err (!%p418_p1)
}
  0x21   :  { %32 = dma.hbm_to_vmem [thread:$0]  %s518_s1, 2048, %s27_s24, [#allocation5], %s427_s19, %s427_s19, %s428_s20  }
  0x22   :  { %422 = dma.done.wait [#allocation3], 2048  }
  0x23   :  { %423 = vsyncadd [#allocation3], 4294965248 }
  0x24   :  { %424 = dma.done.wait [#allocation5], 2048  }
  0x25   :  { %425 = vsyncadd [#allocation5], 4294965248  ;;  %v55_v0 = vld [vmem:[#allocation4] sm:$0xff]  ;;  %v56_v1 = vld [vmem:[#allocation4 + $0x8] sm:$0xff] }
  0x26   :  { %v57_v2 = vld [vmem:[#allocation4 + $0x10] sm:$0xff]  ;;  %v326_v3 = vpack.c.bf16 %v56_v1, %v55_v0  ;;  %v58_v4 = vld [vmem:[#allocation4 + $0x18] sm:$0xff]  ;;  %v59_v6 = vld [vmem:[#allocation4 + $0x20] sm:$0xff] }
  0x27   :  { %v330_v5 = vpack.c.bf16 %v58_v4, %v57_v2  ;;  %v60_v7 = vld [vmem:[#allocation4 + $0x28] sm:$0xff]  ;;  %v39_v9 = vld [vmem:[#allocation2] sm:$0xff]  ;;  %v61_v11 = vld [vmem:[#allocation4 + $0x30] sm:$0xff] }
  0x28   :  { %327 = vmatprep.subr.bf16.mxu0 %v326_v3  ;;  %358 = vmatprep.subr.bf16.mxu1 %v326_v3  ;;  %v334_v8 = vpack.c.bf16 %v60_v7, %v59_v6  ;;  %v47_v10 = vld [vmem:[#allocation2 + $0x40] sm:$0xff]  ;;  %v62_v12 = vld [vmem:[#allocation4 + $0x38] sm:$0xff]  ;;  %v64_v15 = vld [vmem:[#allocation4 + $0x48] sm:$0xff] }
  0x29   :  { %329 = vmatpush3.bf16.msra.mxu0 %v326_v3  ;;  %366 = vmatpush3.bf16.msra.mxu1 %v326_v3  ;;  %v338_v13 = vpack.c.bf16 %v62_v12, %v61_v11  ;;  %v63_v14 = vld [vmem:[#allocation4 + $0x40] sm:$0xff]  ;;  %v65_v17 = vld [vmem:[#allocation4 + $0x50] sm:$0xff]  ;;  %v66_v18 = vld [vmem:[#allocation4 + $0x58] sm:$0xff] }
  0x2a   :  { %331 = vmatprep.subr.bf16.mxu0 %v330_v5  ;;  %359 = vmatprep.subr.bf16.mxu1 %v330_v5  ;;  %v342_v16 = vpack.c.bf16 %v64_v15, %v63_v14  ;;  %v346_v19 = vpack.c.bf16 %v66_v18, %v65_v17  ;;  %v67_v20 = vld [vmem:[#allocation4 + $0x60] sm:$0xff]  ;;  %v68_v21 = vld [vmem:[#allocation4 + $0x68] sm:$0xff]  ;;  %v69_v23 = vld [vmem:[#allocation4 + $0x70] sm:$0xff] }
  0x2b   :  { %302 = vmatprep.mubr.f32.mxu0 %v39_v9  ;;  %314 = vmatprep.mubr.f32.mxu1 %v47_v10  ;;  %v350_v22 = vpack.c.bf16 %v68_v21, %v67_v20  ;;  %v70_v24 = vld [vmem:[#allocation4 + $0x78] sm:$0xff]  ;;  %v40_v26 = vld [vmem:[#allocation2 + $0x8] sm:$0xff]  ;;  %v41_v28 = vld [vmem:[#allocation2 + $0x10] sm:$0xff] }
  0x2c   :  { %v354_v25 = vpack.c.bf16 %v70_v24, %v69_v23  ;;  %v48_v27 = vld [vmem:[#allocation2 + $0x48] sm:$0xff]  ;;  %v49_v29 = vld [vmem:[#allocation2 + $0x50] sm:$0xff]  ;;  %v42_v30 = vld [vmem:[#allocation2 + $0x18] sm:$0xff] }
  0x2d   :  { %333 = vmatpush3.bf16.msra.mxu0 %v330_v5  ;;  %367 = vmatpush3.bf16.msra.mxu1 %v330_v5  ;;  %v50_v31 = vld [vmem:[#allocation2 + $0x58] sm:$0xff]  ;;  %v43_v32 = vld [vmem:[#allocation2 + $0x20] sm:$0xff]  ;;  %v44_v34 = vld [vmem:[#allocation2 + $0x28] sm:$0xff] }
  0x2e   :  { %335 = vmatprep.subr.bf16.mxu0 %v334_v8  ;;  %360 = vmatprep.subr.bf16.mxu1 %v334_v8  ;;  %v51_v33 = vld [vmem:[#allocation2 + $0x60] sm:$0xff]  ;;  %v52_v35 = vld [vmem:[#allocation2 + $0x68] sm:$0xff]  ;;  %v45_v36 = vld [vmem:[#allocation2 + $0x30] sm:$0xff] }
  0x2f   :  { %v53_v37 = vld [vmem:[#allocation2 + $0x70] sm:$0xff]  ;;  %v46_v38 = vld [vmem:[#allocation2 + $0x38] sm:$0xff] }
  0x30   :  { %v54_v39 = vld [vmem:[#allocation2 + $0x78] sm:$0xff] }
  0x31   :  { %337 = vmatpush3.bf16.msra.mxu0 %v334_v8  ;;  %368 = vmatpush3.bf16.msra.mxu1 %v334_v8 }
  0x32   :  { %339 = vmatprep.subr.bf16.mxu0 %v338_v13  ;;  %361 = vmatprep.subr.bf16.mxu1 %v338_v13 }
  0x35   :  { %341 = vmatpush3.bf16.msra.mxu0 %v338_v13  ;;  %369 = vmatpush3.bf16.msra.mxu1 %v338_v13 }
  0x36   :  { %343 = vmatprep.subr.bf16.mxu0 %v342_v16  ;;  %362 = vmatprep.subr.bf16.mxu1 %v342_v16 }
  0x39   :  { %345 = vmatpush3.bf16.msra.mxu0 %v342_v16  ;;  %370 = vmatpush3.bf16.msra.mxu1 %v342_v16 }
  0x3a   :  { %347 = vmatprep.subr.bf16.mxu0 %v346_v19  ;;  %363 = vmatprep.subr.bf16.mxu1 %v346_v19 }
  0x3d   :  { %349 = vmatpush3.bf16.msra.mxu0 %v346_v19  ;;  %371 = vmatpush3.bf16.msra.mxu1 %v346_v19 }
  0x3e   :  { %351 = vmatprep.subr.bf16.mxu0 %v350_v22  ;;  %364 = vmatprep.subr.bf16.mxu1 %v350_v22 }
  0x41   :  { %353 = vmatpush3.bf16.msra.mxu0 %v350_v22  ;;  %372 = vmatpush3.bf16.msra.mxu1 %v350_v22 }
  0x42   :  { %355 = vmatprep.subr.bf16.mxu0 %v354_v25  ;;  %365 = vmatprep.subr.bf16.mxu1 %v354_v25 }
  0x45   :  { %357 = vmatpush3.bf16.msra.mxu0 %v354_v25  ;;  %373 = vmatpush3.bf16.msra.mxu1 %v354_v25 }
  0x48   :  { %303 = vmatmul.mubr.f32.vlgmr.msra.gmra.mrb[0].mxu0 %v40_v26  ;;  %315 = vmatmul.mubr.f32.vlgmr.msra.gmra.mrb[0].mxu1 %v48_v27 }
  0x49   :  { %305 = vmatprep.mubr.f32.mxu0 %v41_v28  ;;  %317 = vmatprep.mubr.f32.mxu1 %v49_v29 }
  0x4c   :  { %306 = vmatmul.mubr.f32.gmra.mrb[2].mxu0 %v42_v30  ;;  %318 = vmatmul.mubr.f32.gmra.mrb[2].mxu1 %v50_v31 }
  0x4d   :  { %308 = vmatprep.mubr.f32.mxu0 %v43_v32  ;;  %320 = vmatprep.mubr.f32.mxu1 %v51_v33 }
  0x50   :  { %309 = vmatmul.mubr.f32.gmra.mrb[4].mxu0 %v44_v34  ;;  %321 = vmatmul.mubr.f32.gmra.mrb[4].mxu1 %v52_v35 }
  0x51   :  { %311 = vmatprep.mubr.f32.mxu0 %v45_v36  ;;  %323 = vmatprep.mubr.f32.mxu1 %v53_v37 }
  0x54   :  { %312 = vmatmul.mubr.f32.gmra.mrb[6].mxu0 %v46_v38  ;;  %324 = vmatmul.mubr.f32.gmra.mrb[6].mxu1 %v54_v39 }
 0x11b   :  { %v304_v40 = vpop.f32.mrb[0].mxu0  ;;  %v316_v41 = vpop.f32.mrb[0].mxu1 }
 0x11c   :  { %217 = vst [vmem:[%s519_s2 + $0x8] sm:$0xff] %v304_v40  ;;  %225 = vst [vmem:[%s519_s2 + $0x48] sm:$0xff] %v316_v41  ;;  %v137_v42 = vpop.f32.mrb[1].mxu0  ;;  %v177_v43 = vpop.f32.mrb[1].mxu1 }
 0x11d   :  { %216 = vst [vmem:[%s519_s2] sm:$0xff] %v137_v42  ;;  %224 = vst [vmem:[%s519_s2 + $0x40] sm:$0xff] %v177_v43 }
 0x11f   :  { %v307_v44 = vpop.f32.mrb[2].mxu0  ;;  %v319_v45 = vpop.f32.mrb[2].mxu1 }
 0x120   :  { %219 = vst [vmem:[%s519_s2 + $0x18] sm:$0xff] %v307_v44  ;;  %227 = vst [vmem:[%s519_s2 + $0x58] sm:$0xff] %v319_v45  ;;  %v147_v46 = vpop.f32.mrb[3].mxu0  ;;  %v187_v47 = vpop.f32.mrb[3].mxu1 }
 0x121   :  { %218 = vst [vmem:[%s519_s2 + $0x10] sm:$0xff] %v147_v46  ;;  %226 = vst [vmem:[%s519_s2 + $0x50] sm:$0xff] %v187_v47 }
 0x123   :  { %v310_v48 = vpop.f32.mrb[4].mxu0  ;;  %v322_v49 = vpop.f32.mrb[4].mxu1 }
 0x124   :  { %221 = vst [vmem:[%s519_s2 + $0x28] sm:$0xff] %v310_v48  ;;  %229 = vst [vmem:[%s519_s2 + $0x68] sm:$0xff] %v322_v49  ;;  %v157_v50 = vpop.f32.mrb[5].mxu0  ;;  %v197_v51 = vpop.f32.mrb[5].mxu1 }
 0x125   :  { %220 = vst [vmem:[%s519_s2 + $0x20] sm:$0xff] %v157_v50  ;;  %228 = vst [vmem:[%s519_s2 + $0x60] sm:$0xff] %v197_v51 }
 0x127   :  { %v313_v52 = vpop.f32.mrb[6].mxu0  ;;  %v325_v53 = vpop.f32.mrb[6].mxu1 }
 0x128   :  { %223 = vst [vmem:[%s519_s2 + $0x38] sm:$0xff] %v313_v52  ;;  %231 = vst [vmem:[%s519_s2 + $0x78] sm:$0xff] %v325_v53  ;;  %v167_v54 = vpop.f32.mrb[7].mxu0  ;;  %v207_v55 = vpop.f32.mrb[7].mxu1 }
 0x129   :  { %222 = vst [vmem:[%s519_s2 + $0x30] sm:$0xff] %v167_v54  ;;  %230 = vst [vmem:[%s519_s2 + $0x70] sm:$0xff] %v207_v55 }
 0x12a   :  { %236 = vsyncpa [#allocation3], 1 }
 0x12b   :  { %237 = vsyncpa [#allocation5], 1 }

// kernel: gcn_forward_padded.7
= control target key start
LH: loop header
LB: loop body
LE: loop exit
PB: predicated region body
PF: predicated region fallthrough
CT: control target
= control target key end

     0   :  { %s612_s1 = inlined_call_operand.vmem [shape: f32[128,128], index: 1, kind: input, shape index: {}]   ;;  %s613_s0 = inlined_call_operand.vmem [shape: f32[128,128], index: 0, kind: input, shape index: {}]   ;;  %s614_s2 = inlined_call_operand.vmem [shape: f32[128,128], index: 2, kind: output, shape index: {}]  }
   0x1   :  { %v13_v0 = vld [vmem:[%s612_s1] sm:$0xff]  ;;  %v14_v1 = vld [vmem:[%s612_s1 + $0x8] sm:$0xff]  ;;  %v15_v2 = vld [vmem:[%s612_s1 + $0x10] sm:$0xff] }
   0x2   :  { %v405_v3 = vpack.c.bf16 %v14_v1, %v13_v0  ;;  %v16_v4 = vld [vmem:[%s612_s1 + $0x18] sm:$0xff]  ;;  %v17_v6 = vld [vmem:[%s612_s1 + $0x20] sm:$0xff]  ;;  %v18_v7 = vld [vmem:[%s612_s1 + $0x28] sm:$0xff] }
   0x3   :  { %v409_v5 = vpack.c.bf16 %v16_v4, %v15_v2  ;;  %v413_v8 = vpack.c.bf16 %v18_v7, %v17_v6  ;;  %v29_v9 = vld [vmem:[%s613_s0] sm:$0xff]  ;;  %v19_v11 = vld [vmem:[%s612_s1 + $0x30] sm:$0xff]  ;;  %v20_v12 = vld [vmem:[%s612_s1 + $0x38] sm:$0xff] }
   0x4   :  { %406 = vmatprep.subr.bf16.mxu0 %v405_v3  ;;  %437 = vmatprep.subr.bf16.mxu1 %v405_v3  ;;  %v37_v10 = vld [vmem:[%s613_s0 + $0x40] sm:$0xff]  ;;  %v417_v13 = vpack.c.bf16 %v20_v12, %v19_v11  ;;  %v22_v15 = vld [vmem:[%s612_s1 + $0x48] sm:$0xff]  ;;  %v23_v17 = vld [vmem:[%s612_s1 + $0x50] sm:$0xff] }
   0x5   :  { %408 = vmatpush3.bf16.msra.mxu0 %v405_v3  ;;  %445 = vmatpush3.bf16.msra.mxu1 %v405_v3  ;;  %v21_v14 = vld [vmem:[%s612_s1 + $0x40] sm:$0xff]  ;;  %v24_v18 = vld [vmem:[%s612_s1 + $0x58] sm:$0xff]  ;;  %v26_v21 = vld [vmem:[%s612_s1 + $0x68] sm:$0xff] }
   0x6   :  { %410 = vmatprep.subr.bf16.mxu0 %v409_v5  ;;  %438 = vmatprep.subr.bf16.mxu1 %v409_v5  ;;  %v421_v16 = vpack.c.bf16 %v22_v15, %v21_v14  ;;  %v425_v19 = vpack.c.bf16 %v24_v18, %v23_v17  ;;  %v25_v20 = vld [vmem:[%s612_s1 + $0x60] sm:$0xff]  ;;  %v27_v23 = vld [vmem:[%s612_s1 + $0x70] sm:$0xff]  ;;  %v28_v24 = vld [vmem:[%s612_s1 + $0x78] sm:$0xff] }
   0x7   :  { %381 = vmatprep.mubr.f32.mxu0 %v29_v9  ;;  %393 = vmatprep.mubr.f32.mxu1 %v37_v10  ;;  %v429_v22 = vpack.c.bf16 %v26_v21, %v25_v20  ;;  %v433_v25 = vpack.c.bf16 %v28_v24, %v27_v23  ;;  %v30_v26 = vld [vmem:[%s613_s0 + $0x8] sm:$0xff]  ;;  %v31_v28 = vld [vmem:[%s613_s0 + $0x10] sm:$0xff]  ;;  %v32_v30 = vld [vmem:[%s613_s0 + $0x18] sm:$0xff] }
   0x8   :  { %v38_v27 = vld [vmem:[%s613_s0 + $0x48] sm:$0xff]  ;;  %v39_v29 = vld [vmem:[%s613_s0 + $0x50] sm:$0xff]  ;;  %v40_v31 = vld [vmem:[%s613_s0 + $0x58] sm:$0xff] }
   0x9   :  { %412 = vmatpush3.bf16.msra.mxu0 %v409_v5  ;;  %446 = vmatpush3.bf16.msra.mxu1 %v409_v5  ;;  %v33_v32 = vld [vmem:[%s613_s0 + $0x20] sm:$0xff]  ;;  %v34_v34 = vld [vmem:[%s613_s0 + $0x28] sm:$0xff]  ;;  %v35_v36 = vld [vmem:[%s613_s0 + $0x30] sm:$0xff] }
   0xa   :  { %414 = vmatprep.subr.bf16.mxu0 %v413_v8  ;;  %439 = vmatprep.subr.bf16.mxu1 %v413_v8  ;;  %v41_v33 = vld [vmem:[%s613_s0 + $0x60] sm:$0xff]  ;;  %v42_v35 = vld [vmem:[%s613_s0 + $0x68] sm:$0xff]  ;;  %v43_v37 = vld [vmem:[%s613_s0 + $0x70] sm:$0xff] }
   0xb   :  { %v36_v38 = vld [vmem:[%s613_s0 + $0x38] sm:$0xff] }
   0xc   :  { %v44_v39 = vld [vmem:[%s613_s0 + $0x78] sm:$0xff] }
   0xd   :  { %416 = vmatpush3.bf16.msra.mxu0 %v413_v8  ;;  %447 = vmatpush3.bf16.msra.mxu1 %v413_v8 }
   0xe   :  { %418 = vmatprep.subr.bf16.mxu0 %v417_v13  ;;  %440 = vmatprep.subr.bf16.mxu1 %v417_v13 }
  0x11   :  { %420 = vmatpush3.bf16.msra.mxu0 %v417_v13  ;;  %448 = vmatpush3.bf16.msra.mxu1 %v417_v13 }
  0x12   :  { %422 = vmatprep.subr.bf16.mxu0 %v421_v16  ;;  %441 = vmatprep.subr.bf16.mxu1 %v421_v16 }
  0x15   :  { %424 = vmatpush3.bf16.msra.mxu0 %v421_v16  ;;  %449 = vmatpush3.bf16.msra.mxu1 %v421_v16 }
  0x16   :  { %426 = vmatprep.subr.bf16.mxu0 %v425_v19  ;;  %442 = vmatprep.subr.bf16.mxu1 %v425_v19 }
  0x19   :  { %428 = vmatpush3.bf16.msra.mxu0 %v425_v19  ;;  %450 = vmatpush3.bf16.msra.mxu1 %v425_v19 }
  0x1a   :  { %430 = vmatprep.subr.bf16.mxu0 %v429_v22  ;;  %443 = vmatprep.subr.bf16.mxu1 %v429_v22 }
  0x1d   :  { %432 = vmatpush3.bf16.msra.mxu0 %v429_v22  ;;  %451 = vmatpush3.bf16.msra.mxu1 %v429_v22 }
  0x1e   :  { %434 = vmatprep.subr.bf16.mxu0 %v433_v25  ;;  %444 = vmatprep.subr.bf16.mxu1 %v433_v25 }
  0x21   :  { %436 = vmatpush3.bf16.msra.mxu0 %v433_v25  ;;  %452 = vmatpush3.bf16.msra.mxu1 %v433_v25 }
  0x24   :  { %382 = vmatmul.mubr.f32.vlgmr.msra.gmra.mrb[0].mxu0 %v30_v26  ;;  %394 = vmatmul.mubr.f32.vlgmr.msra.gmra.mrb[0].mxu1 %v38_v27 }
  0x25   :  { %384 = vmatprep.mubr.f32.mxu0 %v31_v28  ;;  %396 = vmatprep.mubr.f32.mxu1 %v39_v29 }
  0x28   :  { %385 = vmatmul.mubr.f32.gmra.mrb[2].mxu0 %v32_v30  ;;  %397 = vmatmul.mubr.f32.gmra.mrb[2].mxu1 %v40_v31 }
  0x29   :  { %387 = vmatprep.mubr.f32.mxu0 %v33_v32  ;;  %399 = vmatprep.mubr.f32.mxu1 %v41_v33 }
  0x2c   :  { %388 = vmatmul.mubr.f32.gmra.mrb[4].mxu0 %v34_v34  ;;  %400 = vmatmul.mubr.f32.gmra.mrb[4].mxu1 %v42_v35 }
  0x2d   :  { %390 = vmatprep.mubr.f32.mxu0 %v35_v36  ;;  %402 = vmatprep.mubr.f32.mxu1 %v43_v37 }
  0x30   :  { %391 = vmatmul.mubr.f32.gmra.mrb[6].mxu0 %v36_v38  ;;  %403 = vmatmul.mubr.f32.gmra.mrb[6].mxu1 %v44_v39 }
  0xf7   :  { %v383_v40 = vpop.f32.mrb[0].mxu0  ;;  %v395_v41 = vpop.f32.mrb[0].mxu1 }
  0xf8   :  { %v282_v42 = vmax.f32 %v383_v40, 0.0  ;;  %v290_v43 = vmax.f32 %v395_v41, 0.0  ;;  %v111_v44 = vpop.f32.mrb[1].mxu0  ;;  %v151_v45 = vpop.f32.mrb[1].mxu1 }
  0xf9   :  { %v281_v46 = vmax.f32 %v111_v44, 0.0  ;;  %v289_v47 = vmax.f32 %v151_v45, 0.0 }
  0xfa   :  { %298 = vst [vmem:[%s614_s2 + $0x8] sm:$0xff] %v282_v42  ;;  %306 = vst [vmem:[%s614_s2 + $0x48] sm:$0xff] %v290_v43 }
  0xfb   :  { %297 = vst [vmem:[%s614_s2] sm:$0xff] %v281_v46  ;;  %305 = vst [vmem:[%s614_s2 + $0x40] sm:$0xff] %v289_v47  ;;  %v386_v48 = vpop.f32.mrb[2].mxu0  ;;  %v398_v49 = vpop.f32.mrb[2].mxu1 }
  0xfc   :  { %v284_v50 = vmax.f32 %v386_v48, 0.0  ;;  %v292_v51 = vmax.f32 %v398_v49, 0.0  ;;  %v121_v52 = vpop.f32.mrb[3].mxu0  ;;  %v161_v53 = vpop.f32.mrb[3].mxu1 }
  0xfd   :  { %v283_v54 = vmax.f32 %v121_v52, 0.0  ;;  %v291_v55 = vmax.f32 %v161_v53, 0.0 }
  0xfe   :  { %300 = vst [vmem:[%s614_s2 + $0x18] sm:$0xff] %v284_v50  ;;  %308 = vst [vmem:[%s614_s2 + $0x58] sm:$0xff] %v292_v51 }
  0xff   :  { %299 = vst [vmem:[%s614_s2 + $0x10] sm:$0xff] %v283_v54  ;;  %307 = vst [vmem:[%s614_s2 + $0x50] sm:$0xff] %v291_v55  ;;  %v389_v56 = vpop.f32.mrb[4].mxu0  ;;  %v401_v57 = vpop.f32.mrb[4].mxu1 }
 0x100   :  { %v286_v58 = vmax.f32 %v389_v56, 0.0  ;;  %v294_v59 = vmax.f32 %v401_v57, 0.0  ;;  %v131_v60 = vpop.f32.mrb[5].mxu0  ;;  %v171_v61 = vpop.f32.mrb[5].mxu1 }
 0x101   :  { %v285_v62 = vmax.f32 %v131_v60, 0.0  ;;  %v293_v63 = vmax.f32 %v171_v61, 0.0 }
 0x102   :  { %302 = vst [vmem:[%s614_s2 + $0x28] sm:$0xff] %v286_v58  ;;  %310 = vst [vmem:[%s614_s2 + $0x68] sm:$0xff] %v294_v59 }
 0x103   :  { %301 = vst [vmem:[%s614_s2 + $0x20] sm:$0xff] %v285_v62  ;;  %309 = vst [vmem:[%s614_s2 + $0x60] sm:$0xff] %v293_v63  ;;  %v392_v0 = vpop.f32.mrb[6].mxu0  ;;  %v404_v1 = vpop.f32.mrb[6].mxu1 }
 0x104   :  { %v288_v2 = vmax.f32 %v392_v0, 0.0  ;;  %v296_v3 = vmax.f32 %v404_v1, 0.0  ;;  %v141_v4 = vpop.f32.mrb[7].mxu0  ;;  %v181_v5 = vpop.f32.mrb[7].mxu1 }
 0x105   :  { %v287_v6 = vmax.f32 %v141_v4, 0.0  ;;  %v295_v7 = vmax.f32 %v181_v5, 0.0 }
 0x106   :  { %304 = vst [vmem:[%s614_s2 + $0x38] sm:$0xff] %v288_v2  ;;  %312 = vst [vmem:[%s614_s2 + $0x78] sm:$0xff] %v296_v3 }
 0x107   :  { %303 = vst [vmem:[%s614_s2 + $0x30] sm:$0xff] %v287_v6  ;;  %311 = vst [vmem:[%s614_s2 + $0x70] sm:$0xff] %v295_v7 }

// kernel: gcn_forward_padded.11
= control target key start
LH: loop header
LB: loop body
LE: loop exit
PB: predicated region body
PF: predicated region fallthrough
CT: control target
= control target key end

     0   :  { %s930_s0 = inlined_call_operand.vmem [shape: f32[128,128], index: 0, kind: input, shape index: {}]   ;;  %s931_s1 = inlined_call_operand.vmem [shape: f32[128,128], index: 1, kind: input, shape index: {}]   ;;  %s932_s2 = inlined_call_operand.hbm [shape: f32[128,128], index: 2, kind: output, shape index: {}]  }
   0x1   :  { %v14_v0 = vld [vmem:[%s931_s1] sm:$0xff]  ;;  %v15_v1 = vld [vmem:[%s931_s1 + $0x8] sm:$0xff]  ;;  %v16_v2 = vld [vmem:[%s931_s1 + $0x10] sm:$0xff] }
   0x2   :  { %v565_v3 = vpack.c.bf16 %v15_v1, %v14_v0  ;;  %v17_v4 = vld [vmem:[%s931_s1 + $0x18] sm:$0xff]  ;;  %v18_v6 = vld [vmem:[%s931_s1 + $0x20] sm:$0xff]  ;;  %v19_v7 = vld [vmem:[%s931_s1 + $0x28] sm:$0xff] }
   0x3   :  { %v569_v5 = vpack.c.bf16 %v17_v4, %v16_v2  ;;  %v573_v8 = vpack.c.bf16 %v19_v7, %v18_v6  ;;  %v30_v9 = vld [vmem:[%s930_s0] sm:$0xff]  ;;  %v20_v11 = vld [vmem:[%s931_s1 + $0x30] sm:$0xff]  ;;  %v21_v12 = vld [vmem:[%s931_s1 + $0x38] sm:$0xff] }
   0x4   :  { %566 = vmatprep.subr.bf16.mxu0 %v565_v3  ;;  %597 = vmatprep.subr.bf16.mxu1 %v565_v3  ;;  %v38_v10 = vld [vmem:[%s930_s0 + $0x40] sm:$0xff]  ;;  %v577_v13 = vpack.c.bf16 %v21_v12, %v20_v11  ;;  %v23_v15 = vld [vmem:[%s931_s1 + $0x48] sm:$0xff] }
   0x5   :  { %568 = vmatpush3.bf16.msra.mxu0 %v565_v3  ;;  %605 = vmatpush3.bf16.msra.mxu1 %v565_v3  ;;  %v22_v14 = vld [vmem:[%s931_s1 + $0x40] sm:$0xff] }
   0x6   :  { %570 = vmatprep.subr.bf16.mxu0 %v569_v5  ;;  %598 = vmatprep.subr.bf16.mxu1 %v569_v5 }
   0x7   :  { %541 = vmatprep.mubr.f32.mxu0 %v30_v9  ;;  %553 = vmatprep.mubr.f32.mxu1 %v38_v10 }
   0x9   :  { %572 = vmatpush3.bf16.msra.mxu0 %v569_v5  ;;  %606 = vmatpush3.bf16.msra.mxu1 %v569_v5 }
   0xa   :  { %574 = vmatprep.subr.bf16.mxu0 %v573_v8  ;;  %599 = vmatprep.subr.bf16.mxu1 %v573_v8 }
   0xb   :  { %7 = vsyncpa [#allocation4], 0  ;;  %v581_v16 = vpack.c.bf16 %v23_v15, %v22_v14  ;;  %v24_v17 = vld [vmem:[%s931_s1 + $0x50] sm:$0xff]  ;;  %v25_v18 = vld [vmem:[%s931_s1 + $0x58] sm:$0xff]  ;;  %v282_v40 = vlaneseq }
   0xc   :  { %v585_v19 = vpack.c.bf16 %v25_v18, %v24_v17  ;;  %v26_v20 = vld [vmem:[%s931_s1 + $0x60] sm:$0xff]  ;;  %v27_v21 = vld [vmem:[%s931_s1 + $0x68] sm:$0xff]  ;;  %v28_v23 = vld [vmem:[%s931_s1 + $0x70] sm:$0xff] }
   0xd   :  { %576 = vmatpush3.bf16.msra.mxu0 %v573_v8  ;;  %607 = vmatpush3.bf16.msra.mxu1 %v573_v8  ;;  %v589_v22 = vpack.c.bf16 %v27_v21, %v26_v20  ;;  %v29_v24 = vld [vmem:[%s931_s1 + $0x78] sm:$0xff]  ;;  %v31_v26 = vld [vmem:[%s930_s0 + $0x8] sm:$0xff]  ;;  %v32_v28 = vld [vmem:[%s930_s0 + $0x10] sm:$0xff]  ;;  %v283_v41 = vand.u32 127, %v282_v40 }
   0xe   :  { %578 = vmatprep.subr.bf16.mxu0 %v577_v13  ;;  %600 = vmatprep.subr.bf16.mxu1 %v577_v13  ;;  %v593_v25 = vpack.c.bf16 %v29_v24, %v28_v23  ;;  %v39_v27 = vld [vmem:[%s930_s0 + $0x48] sm:$0xff]  ;;  %v40_v29 = vld [vmem:[%s930_s0 + $0x50] sm:$0xff]  ;;  %v33_v30 = vld [vmem:[%s930_s0 + $0x18] sm:$0xff] }
   0xf   :  { %v41_v31 = vld [vmem:[%s930_s0 + $0x58] sm:$0xff]  ;;  %v34_v32 = vld [vmem:[%s930_s0 + $0x20] sm:$0xff]  ;;  %v35_v34 = vld [vmem:[%s930_s0 + $0x28] sm:$0xff]  ;;  %vm284_vm0 = vcmp.lt.s32.totalorder %v283_v41, 8 }
  0x10   :  { %v42_v33 = vld [vmem:[%s930_s0 + $0x60] sm:$0xff]  ;;  %v43_v35 = vld [vmem:[%s930_s0 + $0x68] sm:$0xff]  ;;  %v36_v36 = vld [vmem:[%s930_s0 + $0x30] sm:$0xff] }
  0x11   :  { %580 = vmatpush3.bf16.msra.mxu0 %v577_v13  ;;  %608 = vmatpush3.bf16.msra.mxu1 %v577_v13  ;;  %v44_v37 = vld [vmem:[%s930_s0 + $0x70] sm:$0xff]  ;;  %v37_v38 = vld [vmem:[%s930_s0 + $0x38] sm:$0xff] }
  0x12   :  { %582 = vmatprep.subr.bf16.mxu0 %v581_v16  ;;  %601 = vmatprep.subr.bf16.mxu1 %v581_v16  ;;  %v45_v39 = vld [vmem:[%s930_s0 + $0x78] sm:$0xff]  ;;  %s704_s0 = smov [#allocation3]  }
  0x13   :  { %s466_s16 = sshll.u32 %s704_s0, 4  ;;  %s467_s16 = int_to_ptr.vmem [resolvable:$true] %s466_s16 }
  0x14   :  { %s680_s17 = scalar_lea.vmem %s467_s16, 2048  ;;  %p685_p1 = scmp.lt.s32.totalorder %s467_s16, %s467_s16 }
  0x15   :  { %584 = vmatpush3.bf16.msra.mxu0 %v581_v16  ;;  %609 = vmatpush3.bf16.msra.mxu1 %v581_v16  ;;  %p681_p0 = scmp.ne.s32.totalorder %s467_s16, %s680_s17  ;;  %p686_p2 = scmp.lt.s32.totalorder %s680_s17, %s680_s17 }
  0x16   :  { %586 = vmatprep.subr.bf16.mxu0 %v585_v19  ;;  %602 = vmatprep.subr.bf16.mxu1 %v585_v19 }
  0x17   :  { %p687_p3 = por %p686_p2, %p685_p1 }
  0x19   :  { %588 = vmatpush3.bf16.msra.mxu0 %v585_v19  ;;  %610 = vmatpush3.bf16.msra.mxu1 %v585_v19  ;;  %p688_p4 = pnand %p687_p3, %p681_p0 }
  0x1a   :  { %590 = vmatprep.subr.bf16.mxu0 %v589_v22  ;;  %603 = vmatprep.subr.bf16.mxu1 %v589_v22 }
  0x1d   :  { %592 = vmatpush3.bf16.msra.mxu0 %v589_v22  ;;  %611 = vmatpush3.bf16.msra.mxu1 %v589_v22 }
  0x1e   :  { %594 = vmatprep.subr.bf16.mxu0 %v593_v25  ;;  %604 = vmatprep.subr.bf16.mxu1 %v593_v25 }
  0x21   :  { %596 = vmatpush3.bf16.msra.mxu0 %v593_v25  ;;  %612 = vmatpush3.bf16.msra.mxu1 %v593_v25 }
  0x24   :  { %542 = vmatmul.mubr.f32.vlgmr.msra.gmra.mrb[0].mxu0 %v31_v26  ;;  %554 = vmatmul.mubr.f32.vlgmr.msra.gmra.mrb[0].mxu1 %v39_v27 }
  0x25   :  { %544 = vmatprep.mubr.f32.mxu0 %v32_v28  ;;  %556 = vmatprep.mubr.f32.mxu1 %v40_v29 }
  0x28   :  { %545 = vmatmul.mubr.f32.gmra.mrb[2].mxu0 %v33_v30  ;;  %557 = vmatmul.mubr.f32.gmra.mrb[2].mxu1 %v41_v31 }
  0x29   :  { %547 = vmatprep.mubr.f32.mxu0 %v34_v32  ;;  %559 = vmatprep.mubr.f32.mxu1 %v42_v33 }
  0x2c   :  { %548 = vmatmul.mubr.f32.gmra.mrb[4].mxu0 %v35_v34  ;;  %560 = vmatmul.mubr.f32.gmra.mrb[4].mxu1 %v43_v35 }
  0x2d   :  { %550 = vmatprep.mubr.f32.mxu0 %v36_v36  ;;  %562 = vmatprep.mubr.f32.mxu1 %v44_v37 }
  0x30   :  { %551 = vmatmul.mubr.f32.gmra.mrb[6].mxu0 %v37_v38  ;;  %563 = vmatmul.mubr.f32.gmra.mrb[6].mxu1 %v45_v39 }
  0xf7   :  { %v543_v42 = vpop.f32.mrb[0].mxu0  ;;  %v555_v43 = vpop.f32.mrb[0].mxu1 }
  0xf8   :  { %v112_v44 = vpop.f32.mrb[1].mxu0  ;;  %v152_v45 = vpop.f32.mrb[1].mxu1  ;;  %v294_v46 = vsel %vm284_vm0, %v555_v43, -1e+30  ;;  %v286_v47 = vsel %vm284_vm0, %v543_v42, -1e+30 }
  0xf9   :  { %319 = vmax.xlane.f32.xlu1 %v294_v46  ;;  %303 = vmax.xlane.f32.xlu0 %v286_v47  ;;  %v285_v51 = vsel %vm284_vm0, %v112_v44, -1e+30  ;;  %v293_v57 = vsel %vm284_vm0, %v152_v45, -1e+30 }
  0xfb   :  { %v546_v48 = vpop.f32.mrb[2].mxu0  ;;  %v558_v49 = vpop.f32.mrb[2].mxu1 }
  0xfc   :  { %v122_v50 = vpop.f32.mrb[3].mxu0  ;;  %v288_v52 = vsel %vm284_vm0, %v546_v48, -1e+30  ;;  %v162_v53 = vpop.f32.mrb[3].mxu1  ;;  %v296_v54 = vsel %vm284_vm0, %v558_v49, -1e+30 }
  0xfd   :  { %301 = vmax.xlane.f32.xlu0 %v285_v51  ;;  %307 = vmax.xlane.f32.xlu1 %v288_v52  ;;  %v295_v62 = vsel %vm284_vm0, %v162_v53, -1e+30  ;;  %v287_v63 = vsel %vm284_vm0, %v122_v50, -1e+30 }
  0xff   :  { %v549_v55 = vpop.f32.mrb[4].mxu0  ;;  %v561_v56 = vpop.f32.mrb[4].mxu1 }
 0x100   :  { %v132_v58 = vpop.f32.mrb[5].mxu0  ;;  %v172_v59 = vpop.f32.mrb[5].mxu1  ;;  %v290_v2 = vsel %vm284_vm0, %v549_v55, -1e+30  ;;  %v298_v4 = vsel %vm284_vm0, %v561_v56, -1e+30 }
 0x101   :  { %317 = vmax.xlane.f32.xlu0 %v293_v57  ;;  %323 = vmax.xlane.f32.xlu1 %v296_v54  ;;  %v289_v3 = vsel %vm284_vm0, %v132_v58, -1e+30  ;;  %v830_v5 = vsel %vm284_vm0, %v172_v59, -1e+30 }
 0x103   :  { %v552_v60 = vpop.f32.mrb[6].mxu0  ;;  %v564_v61 = vpop.f32.mrb[6].mxu1 }
 0x104   :  { %v142_v0 = vpop.f32.mrb[7].mxu0  ;;  %v182_v1 = vpop.f32.mrb[7].mxu1  ;;  %v834_v6 = vsel %vm284_vm0, %v552_v60, -1e+30  ;;  %v842_v8 = vsel %vm284_vm0, %v564_v61, -1e+30 }
 0x105   :  { %321 = vmax.xlane.f32.xlu0 %v295_v62  ;;  %305 = vmax.xlane.f32.xlu1 %v287_v63  ;;  %v837_v7 = vsel %vm284_vm0, %v142_v0, -1e+30  ;;  %v845_v9 = vsel %vm284_vm0, %v182_v1, -1e+30 }
 0x109   :  { %311 = vmax.xlane.f32.xlu1 %v290_v2  ;;  %309 = vmax.xlane.f32.xlu0 %v289_v3 }
 0x10d   :  { %327 = vmax.xlane.f32.xlu1 %v298_v4  ;;  %325 = vmax.xlane.f32.xlu0 %v830_v5 }
 0x111   :  { %315 = vmax.xlane.f32.xlu1 %v834_v6  ;;  %313 = vmax.xlane.f32.xlu0 %v837_v7 }
 0x115   :  { %331 = vmax.xlane.f32.xlu1 %v842_v8  ;;  %329 = vmax.xlane.f32.xlu0 %v845_v9 }
 0x186   :  { %v320_v10 = vpop.xlane.xlu1 %319  ;;  %v304_v11 = vpop.xlane.xlu0 %303 }
 0x187   :  { %v334_v12 = vsub.f32 %v286_v47, %v304_v11  ;;  %v342_v13 = vsub.f32 %v294_v46, %v320_v10 }
 0x189   :  { %v351_v14 = vmul.f32 1.442695, %v334_v12  ;;  %v367_v18 = vmul.f32 1.442695, %v342_v13 }
 0x18a   :  { %v302_v15 = vpop.xlane.xlu0 %301  ;;  %v308_v16 = vpop.xlane.xlu1 %307 }
 0x18b   :  { %v333_v17 = vsub.f32 %v285_v51, %v302_v15  ;;  %616 = vpow2.f32 %v351_v14  ;;  %v336_v19 = vsub.f32 %v288_v52, %v308_v16 }
 0x18d   :  { %v349_v20 = vmul.f32 1.442695, %v333_v17  ;;  %v355_v25 = vmul.f32 1.442695, %v336_v19 }
 0x18e   :  { %v318_v21 = vpop.xlane.xlu0 %317  ;;  %v324_v22 = vpop.xlane.xlu1 %323 }
 0x18f   :  { %618 = vpow2.f32 %v349_v20  ;;  %v341_v23 = vsub.f32 %v293_v57, %v318_v21  ;;  %v344_v24 = vsub.f32 %v296_v54, %v324_v22 }
 0x190   :  { %620 = vpow2.f32 %v367_v18 }
 0x191   :  { %v365_v26 = vmul.f32 1.442695, %v341_v23  ;;  %v371_v29 = vmul.f32 1.442695, %v344_v24 }
 0x192   :  { %v322_v27 = vpop.xlane.xlu0 %321  ;;  %v306_v28 = vpop.xlane.xlu1 %305 }
 0x193   :  { %622 = vpow2.f32 %v365_v26  ;;  %v335_v30 = vsub.f32 %v287_v63, %v306_v28  ;;  %v343_v31 = vsub.f32 %v295_v62, %v322_v27 }
 0x194   :  { %624 = vpow2.f32 %v355_v25 }
 0x195   :  { %v353_v32 = vmul.f32 1.442695, %v335_v30  ;;  %v849_v33 = vpop.eup %616  ;;  %626 = vpow2.f32 %v371_v29  ;;  %v369_v37 = vmul.f32 1.442695, %v343_v31 }
 0x196   :  { %v312_v34 = vpop.xlane.xlu1 %311  ;;  %v310_v35 = vpop.xlane.xlu0 %309  ;;  %383 = vadd.xlane.f32.xlu1 %v849_v33 }
 0x197   :  { %v338_v36 = vsub.f32 %v290_v2, %v312_v34  ;;  %628 = vpow2.f32 %v353_v32  ;;  %v337_v38 = vsub.f32 %v289_v3, %v310_v35 }
 0x199   :  { %v852_v39 = vpop.eup %618  ;;  %v359_v40 = vmul.f32 1.442695, %v338_v36  ;;  %v357_v45 = vmul.f32 1.442695, %v337_v38 }
 0x19a   :  { %v854_v41 = vpop.eup %620  ;;  %v328_v42 = vpop.xlane.xlu1 %327  ;;  %381 = vadd.xlane.f32.xlu0 %v852_v39 }
 0x19b   :  { %v326_v43 = vpop.xlane.xlu0 %325  ;;  %630 = vpow2.f32 %v359_v40  ;;  %v346_v44 = vsub.f32 %v298_v4, %v328_v42  ;;  %399 = vadd.xlane.f32.xlu1 %v854_v41 }
 0x19c   :  { %632 = vpow2.f32 %v369_v37  ;;  %v345_v46 = vsub.f32 %v830_v5, %v326_v43 }
 0x19d   :  { %v859_v47 = vpop.eup %622  ;;  %v375_v48 = vmul.f32 1.442695, %v346_v44 }
 0x19e   :  { %v861_v49 = vpop.eup %624  ;;  %v316_v50 = vpop.xlane.xlu1 %315  ;;  %397 = vadd.xlane.f32.xlu0 %v859_v47  ;;  %v373_v53 = vmul.f32 1.442695, %v345_v46 }
 0x19f   :  { %v314_v51 = vpop.xlane.xlu0 %313  ;;  %634 = vpow2.f32 %v375_v48  ;;  %387 = vadd.xlane.f32.xlu1 %v861_v49  ;;  %v340_v52 = vsub.f32 %v834_v6, %v316_v50  ;;  %v867_v55 = vpop.eup %626 }
 0x1a0   :  { %636 = vpow2.f32 %v357_v45  ;;  %v339_v54 = vsub.f32 %v837_v7, %v314_v51 }
 0x1a1   :  { %v363_v56 = vmul.f32 1.442695, %v340_v52  ;;  %v869_v57 = vpop.eup %628 }
 0x1a2   :  { %v332_v58 = vpop.xlane.xlu1 %331  ;;  %385 = vadd.xlane.f32.xlu0 %v869_v57  ;;  %v361_v61 = vmul.f32 1.442695, %v339_v54 }
 0x1a3   :  { %v330_v59 = vpop.xlane.xlu0 %329  ;;  %638 = vpow2.f32 %v363_v56  ;;  %403 = vadd.xlane.f32.xlu1 %v867_v55  ;;  %v348_v60 = vsub.f32 %v842_v8, %v332_v58 }
 0x1a4   :  { %640 = vpow2.f32 %v373_v53  ;;  %v347_v62 = vsub.f32 %v845_v9, %v330_v59 }
 0x1a5   :  { %v875_v63 = vpop.eup %630  ;;  %v379_v0 = vmul.f32 1.442695, %v348_v60 }
 0x1a6   :  { %v877_v1 = vpop.eup %632  ;;  %v377_v2 = vmul.f32 1.442695, %v347_v62 }
 0x1a7   :  { %642 = vpow2.f32 %v379_v0  ;;  %391 = vadd.xlane.f32.xlu1 %v875_v63  ;;  %401 = vadd.xlane.f32.xlu0 %v877_v1 }
 0x1a8   :  { %644 = vpow2.f32 %v361_v61 }
 0x1a9   :  { %v881_v3 = vpop.eup %634  ;;  %646 = vpow2.f32 %v377_v2 }
 0x1aa   :  { %v883_v4 = vpop.eup %636 }
 0x1ab   :  { %407 = vadd.xlane.f32.xlu1 %v881_v3  ;;  %389 = vadd.xlane.f32.xlu0 %v883_v4 }
 0x1ad   :  { %v887_v5 = vpop.eup %638 }
 0x1ae   :  { %v889_v6 = vpop.eup %640 }
 0x1af   :  { %395 = vadd.xlane.f32.xlu1 %v887_v5  ;;  %405 = vadd.xlane.f32.xlu0 %v889_v6 }
 0x1b1   :  { %v893_v7 = vpop.eup %642 }
 0x1b2   :  { %v895_v8 = vpop.eup %644 }
 0x1b3   :  { %411 = vadd.xlane.f32.xlu1 %v893_v7  ;;  %393 = vadd.xlane.f32.xlu0 %v895_v8  ;;  %v899_v9 = vpop.eup %646 }
 0x1b7   :  { %409 = vadd.xlane.f32.xlu0 %v899_v9 }
 0x223   :  { %v384_v10 = vpop.xlane.xlu1 %383 }
 0x224   :  { %648 = vrcp.f32 %v384_v10 }
 0x227   :  { %v382_v11 = vpop.xlane.xlu0 %381 }
 0x228   :  { %v400_v12 = vpop.xlane.xlu1 %399  ;;  %650 = vrcp.f32 %v382_v11 }
 0x229   :  { %652 = vrcp.f32 %v400_v12 }
 0x22b   :  { %v398_v13 = vpop.xlane.xlu0 %397 }
 0x22c   :  { %v388_v14 = vpop.xlane.xlu1 %387  ;;  %654 = vrcp.f32 %v398_v13 }
 0x22d   :  { %656 = vrcp.f32 %v388_v14 }
 0x22e   :  { %v649_v15 = vpop.eup %648 }
 0x22f   :  { %v416_v16 = vmul.f32 %v649_v15, %v849_v33  ;;  %v386_v18 = vpop.xlane.xlu0 %385 }
 0x230   :  { %v404_v17 = vpop.xlane.xlu1 %403 }
 0x231   :  { %658 = vrcp.f32 %v404_v17  ;;  %446 = vst [vmem:[#allocation3 + $0x8] sm:$0xff] %v416_v16 }
 0x232   :  { %v651_v19 = vpop.eup %650  ;;  %660 = vrcp.f32 %v386_v18 }
 0x233   :  { %v653_v20 = vpop.eup %652  ;;  %v414_v21 = vmul.f32 %v651_v19, %v852_v39 }
 0x234   :  { %v432_v22 = vmul.f32 %v653_v20, %v854_v41  ;;  %v392_v23 = vpop.xlane.xlu1 %391  ;;  %v402_v24 = vpop.xlane.xlu0 %401 }
 0x235   :  { %445 = vst [vmem:[#allocation3] sm:$0xff] %v414_v21  ;;  %662 = vrcp.f32 %v392_v23 }
 0x236   :  { %v655_v25 = vpop.eup %654  ;;  %454 = vst [vmem:[#allocation3 + $0x48] sm:$0xff] %v432_v22  ;;  %664 = vrcp.f32 %v402_v24 }
 0x237   :  { %v657_v26 = vpop.eup %656  ;;  %v430_v27 = vmul.f32 %v655_v25, %v859_v47 }
 0x238   :  { %v420_v28 = vmul.f32 %v657_v26, %v861_v49  ;;  %v408_v29 = vpop.xlane.xlu1 %407  ;;  %v390_v30 = vpop.xlane.xlu0 %389 }
 0x239   :  { %453 = vst [vmem:[#allocation3 + $0x40] sm:$0xff] %v430_v27  ;;  %666 = vrcp.f32 %v408_v29 }
 0x23a   :  { %448 = vst [vmem:[#allocation3 + $0x18] sm:$0xff] %v420_v28  ;;  %668 = vrcp.f32 %v390_v30 }
 0x23b   :  { %v659_v31 = vpop.eup %658 }
 0x23c   :  { %v661_v32 = vpop.eup %660  ;;  %v436_v33 = vmul.f32 %v659_v31, %v867_v55  ;;  %v396_v34 = vpop.xlane.xlu1 %395 }
 0x23d   :  { %v406_v35 = vpop.xlane.xlu0 %405  ;;  %v418_v36 = vmul.f32 %v661_v32, %v869_v57  ;;  %670 = vrcp.f32 %v396_v34 }
 0x23e   :  { %456 = vst [vmem:[#allocation3 + $0x58] sm:$0xff] %v436_v33  ;;  %672 = vrcp.f32 %v406_v35 }
 0x23f   :  { %v663_v37 = vpop.eup %662  ;;  %447 = vst [vmem:[#allocation3 + $0x10] sm:$0xff] %v418_v36 }
 0x240   :  { %v665_v38 = vpop.eup %664  ;;  %v424_v39 = vmul.f32 %v663_v37, %v875_v63  ;;  %v412_v40 = vpop.xlane.xlu1 %411 }
 0x241   :  { %v394_v41 = vpop.xlane.xlu0 %393  ;;  %v434_v42 = vmul.f32 %v665_v38, %v877_v1  ;;  %674 = vrcp.f32 %v412_v40 }
 0x242   :  { %450 = vst [vmem:[#allocation3 + $0x28] sm:$0xff] %v424_v39  ;;  %676 = vrcp.f32 %v394_v41 }
 0x243   :  { %v667_v43 = vpop.eup %666  ;;  %455 = vst [vmem:[#allocation3 + $0x50] sm:$0xff] %v434_v42 }
 0x244   :  { %v669_v44 = vpop.eup %668  ;;  %v440_v45 = vmul.f32 %v667_v43, %v881_v3 }
 0x245   :  { %v410_v46 = vpop.xlane.xlu0 %409  ;;  %v422_v47 = vmul.f32 %v669_v44, %v883_v4 }
 0x246   :  { %678 = vrcp.f32 %v410_v46  ;;  %458 = vst [vmem:[#allocation3 + $0x68] sm:$0xff] %v440_v45 }
 0x247   :  { %v671_v48 = vpop.eup %670  ;;  %449 = vst [vmem:[#allocation3 + $0x20] sm:$0xff] %v422_v47 }
 0x248   :  { %v673_v49 = vpop.eup %672  ;;  %v428_v50 = vmul.f32 %v671_v48, %v887_v5 }
 0x249   :  { %v438_v51 = vmul.f32 %v673_v49, %v889_v6 }
 0x24a   :  { %452 = vst [vmem:[#allocation3 + $0x38] sm:$0xff] %v428_v50 }
 0x24b   :  { %v675_v52 = vpop.eup %674  ;;  %457 = vst [vmem:[#allocation3 + $0x60] sm:$0xff] %v438_v51 }
 0x24c   :  { %v677_v53 = vpop.eup %676  ;;  %v444_v54 = vmul.f32 %v675_v52, %v893_v7 }
 0x24d   :  { %v426_v55 = vmul.f32 %v677_v53, %v895_v8 }
 0x24e   :  { %460 = vst [vmem:[#allocation3 + $0x78] sm:$0xff] %v444_v54 }
 0x24f   :  { %451 = vst [vmem:[#allocation3 + $0x30] sm:$0xff] %v426_v55 }
 0x250   :  { %v679_v56 = vpop.eup %678 }
 0x251   :  { %v442_v57 = vmul.f32 %v679_v56, %v899_v9 }
 0x253   :  { %459 = vst [vmem:[#allocation3 + $0x70] sm:$0xff] %v442_v57 }
 0x254   :  { %691 = shalt.err (!%p688_p4)
}
 0x255   :  { %s692_s20 = scalar_lea.hbm %s932_s2, 2048 }
 0x256   :  { %p693_p5 = scmp.ne.s32.totalorder %s932_s2, %s692_s20  ;;  %p696_p6 = scmp.lt.u32.totalorder %s692_s20, %s932_s2 }
 0x258   :  { %p698_p7 = pnand %p696_p6, %p693_p5 }
 0x25a   :  { %701 = shalt.err (!%p698_p7)
}
 0x25b   :  { %s705_s24 = smov 128   ;;  %s706_s25 = smov 8  }
 0x25c   :  { %472 = dma.vmem_to_hbm [thread:$0]  %s467_s16, 2048, %s932_s2, [#allocation4], %s705_s24, %s705_s24, %s706_s25  }
 0x25d   :  { %702 = dma.done.wait [#allocation4], 2048  }
 0x25e   :  { %703 = vsyncadd [#allocation4], 4294965248 }
 0x25f   :  { %476 = vsyncpa [#allocation4], 1 }

</bundles_post_ra>
